<compile_context>
chip_gen: v5e
topology: v5e:2x2
jax: 0.10.0
libtpu: 0.0.40
codegen_flags: <defaults>
</compile_context>

<pallas_src>
import numpy as np
import jax
import jax.numpy as jnp
from jax import lax
from jax.experimental import pallas as pl
from jax.experimental.pallas import tpu as pltpu  # noqa: F401  (TPU target; no TPU-specific params needed)

NUM_INPUTS = 4
NUM_OUTPUTS = 2                 # action_space.n (e.g. CartPole)

# real layer sizes (match the PyTorch module)
H_IN = 100 * NUM_INPUTS         # 400
H1 = 320
H2 = 320
H3 = 100 * NUM_OUTPUTS          # 200

# lane/sublane-aligned padded sizes (zero weight columns + zero initial membrane for the
# padded neurons guarantee they never spike and never contribute downstream)
IN_PAD = 8                      # f32 sublane granule; lanes 0:4 are real
H_IN_P = 512
H1_P = 384
H2_P = 384
H3_P = 256
OUT_PAD = 128                   # fused head: cols 0:2 actor, col 2 critic, rest zero-pad

BETA_IN = 0.95                  # lif_in beta (learn_beta only matters for training)
BETA = 0.95                     # lif1/lif2/lif3 beta
THRESHOLD = 1.0


def _leaky_step(cur, mem, beta, thr):
    """snnTorch Leaky, reset_mechanism='subtract'."""
    reset = (mem > thr).astype(jnp.float32)
    mem_new = beta * mem + cur - reset * thr
    spk = (mem_new > thr).astype(jnp.float32)
    return spk, mem_new


def snn_kernel(x_ref, scale_ref, off_ref,
               w0_ref, w1_ref, w23_ref, wh_ref, bh_ref,
               mem_in0_ref, mem1_0_ref, mem2_0_ref, mem3_0_ref,
               out_ref, mem_in_ref, mem1_ref, mem2_ref, mem3_ref):
    T = x_ref.shape[0]

    # small resident values hoisted out of the timestep loop
    scale = scale_ref[...]          # (1, IN_PAD)
    off = off_ref[...]              # (1, IN_PAD)
    w0 = w0_ref[...]                # (IN_PAD, H_IN_P) f32, only rows 0:4 nonzero
    bh = bh_ref[...]                # (1, OUT_PAD)     f32

    def step(t, carry):
        mem_in, mem1, mem2, mem3 = carry

        # input normalization: (x - inp_min)/(inp_max - inp_min) == x*scale + offset (FMA)
        xn = x_ref[t] * scale + off                       # (B_pad, IN_PAD)

        # cont_to_spike_layer: contraction depth 4 → 4 VPU FMAs (skips an MXU round trip)
        cur_in = xn[:, 0:1] * w0[0:1, :]
        for k in range(1, NUM_INPUTS):
            cur_in = cur_in + xn[:, k:k + 1] * w0[k:k + 1, :]
        spk_in, mem_in = _leaky_step(cur_in, mem_in, BETA_IN, THRESHOLD)

        # layer1 + lif1 (bf16 weights, 0/1 spikes exact in bf16, f32 accumulate)
        cur1 = jnp.dot(spk_in.astype(jnp.bfloat16), w1_ref[...],
                       preferred_element_type=jnp.float32)
        spk1, mem1 = _leaky_step(cur1, mem1, BETA, THRESHOLD)
        spk1_b = spk1.astype(jnp.bfloat16)

        # layer2 + layer3 fused into one MXU call (both consume spk1 in the reference).
        # Slice point H2_P=384 is a lane-tile boundary → free static slices.
        cur23 = jnp.dot(spk1_b, w23_ref[...], preferred_element_type=jnp.float32)
        _, mem2 = _leaky_step(cur23[:, :H2_P], mem2, BETA, THRESHOLD)   # spk2 never used
        spk3, mem3 = _leaky_step(cur23[:, H2_P:], mem3, BETA, THRESHOLD)

        # fused actor/critic head (no sigmoid in the reference forward)
        head = jnp.dot(spk3.astype(jnp.bfloat16), wh_ref[...],
                       preferred_element_type=jnp.float32) + bh
        out_ref[t] = head
        return (mem_in, mem1, mem2, mem3)

    carry0 = (mem_in0_ref[...], mem1_0_ref[...], mem2_0_ref[...], mem3_0_ref[...])
    mem_in_f, mem1_f, mem2_f, mem3_f = lax.fori_loop(0, T, step, carry0)

    # final recurrent state written back once
    mem_in_ref[...] = mem_in_f
    mem1_ref[...] = mem1_f
    mem2_ref[...] = mem2_f
    mem3_ref[...] = mem3_f


def _round_up(n, m):
    return ((n + m - 1) // m) * m


def actor_critic_snn_forward(x, params, mems):
    """x: (B, NUM_INPUTS) single step, or (T, B, NUM_INPUTS) rollout.

    Returns (val, actions, new_mems); shapes (B,1)/(B,2) for single step,
    (T,B,1)/(T,B,2) for a rollout.  new_mems is the state after the last step.
    """
    f32 = jnp.float32
    single_step = (x.ndim == 2)
    if single_step:
        x = x[None]
    T, B, _ = x.shape
    B_pad = max(8, _round_up(B, 8))

    # only the observation + current state are padded per call; weights are pre-packed
    x_p = jnp.zeros((T, B_pad, IN_PAD), f32).at[:, :B, :NUM_INPUTS].set(x.astype(f32))

    def pad_state(s, n_pad):
        return jnp.zeros((B_pad, n_pad), f32).at[:B, :s.shape[1]].set(s.astype(f32))

    mem_in0 = pad_state(mems["mem_in"], H_IN_P)
    mem1_0 = pad_state(mems["mem1"], H1_P)
    mem2_0 = pad_state(mems["mem2"], H2_P)
    mem3_0 = pad_state(mems["mem3"], H3_P)

    out_shape = (
        jax.ShapeDtypeStruct((T, B_pad, OUT_PAD), f32),   # per-step fused head output
        jax.ShapeDtypeStruct((B_pad, H_IN_P), f32),       # final mem_in
        jax.ShapeDtypeStruct((B_pad, H1_P), f32),
        jax.ShapeDtypeStruct((B_pad, H2_P), f32),
        jax.ShapeDtypeStruct((B_pad, H3_P), f32),
    )

    flops = 2 * T * B_pad * (NUM_INPUTS * H_IN_P + H_IN_P * H1_P
                             + H1_P * (H2_P + H3_P) + H3_P * OUT_PAD)
    bytes_accessed = (IN_PAD * H_IN_P * 4
                      + (H_IN_P * H1_P + H1_P * (H2_P + H3_P) + H3_P * OUT_PAD) * 2
                      + 2 * B_pad * (H_IN_P + H1_P + H2_P + H3_P) * 4
                      + T * B_pad * (IN_PAD + OUT_PAD) * 4)
    cost = pl.CostEstimate(flops=flops, transcendentals=0, bytes_accessed=bytes_accessed)

    # No grid: everything (weights, state, the whole T-step x / out slabs) is resident in
    # VMEM for the duration of the kernel (~1.1 MB total — trivial on v5e/v6e/v7x).
    out, mem_in_f, mem1_f, mem2_f, mem3_f = pl.pallas_call(
        snn_kernel,
        out_shape=out_shape,
        cost_estimate=cost,
    )(x_p, params["scale_p"], params["offset_p"],
      params["w0_p"], params["w1"], params["w23"], params["wh"], params["bh"],
      mem_in0, mem1_0, mem2_0, mem3_0)

    actions = out[:, :B, :NUM_OUTPUTS]                  # actor_linear(spk3)
    val = out[:, :B, NUM_OUTPUTS:NUM_OUTPUTS + 1]       # critic_linear(spk3)
    new_mems = dict(mem_in=mem_in_f[:B, :H_IN], mem1=mem1_f[:B, :H1],
                    mem2=mem2_f[:B, :H2], mem3=mem3_f[:B, :H3])
    if single_step:
        val, actions = val[0], actions[0]
    return val, actions, new_mems


def pack_params(w0, w1, w2, w3, wa, ba, wc, bc, inp_min, inp_max):
    """One-time padding / fusion / dtype cast — hoisted out of the per-call hot path.

    All weights are stored pre-transposed as (in_features, out_features) and zero-padded to
    lane/sublane-aligned sizes.  Padded columns/rows are exactly zero (correctness
    invariant: padded neurons never cross THRESHOLD).
    """
    f32, bf16 = jnp.float32, jnp.bfloat16
    scale = 1.0 / (inp_max - inp_min)
    offset = -inp_min * scale
    scale_p = jnp.zeros((1, IN_PAD), f32).at[0, :NUM_INPUTS].set(scale)
    offset_p = jnp.zeros((1, IN_PAD), f32).at[0, :NUM_INPUTS].set(offset)

    w0_p = jnp.zeros((IN_PAD, H_IN_P), f32).at[:NUM_INPUTS, :H_IN].set(w0)
    w1_p = jnp.zeros((H_IN_P, H1_P), f32).at[:H_IN, :H1].set(w1)

    # fused layer2|layer3 weight: cols 0:H2_P from layer2, cols H2_P: from layer3
    w23_p = jnp.zeros((H1_P, H2_P + H3_P), f32)
    w23_p = w23_p.at[:H1, :H2].set(w2)
    w23_p = w23_p.at[:H1, H2_P:H2_P + H3].set(w3)

    # fused head: columns 0:NUM_OUTPUTS = actor, column NUM_OUTPUTS = critic
    wh = jnp.zeros((H3_P, OUT_PAD), f32).at[:H3, :NUM_OUTPUTS].set(wa)
    wh = wh.at[:H3, NUM_OUTPUTS].set(wc[:, 0])
    bh = jnp.zeros((1, OUT_PAD), f32).at[0, :NUM_OUTPUTS].set(ba)
    bh = bh.at[0, NUM_OUTPUTS].set(bc[0])

    return dict(scale_p=scale_p, offset_p=offset_p, w0_p=w0_p,
                w1=w1_p.astype(bf16), w23=w23_p.astype(bf16),
                wh=wh.astype(bf16), bh=bh)


def init_params(key):
    """PyTorch-default nn.Linear init (uniform ±1/sqrt(fan_in)), bias only on the heads."""
    f32 = jnp.float32
    ks = jax.random.split(key, 8)

    def linear_w(k, fan_in, fan_out):
        b = float(1.0 / np.sqrt(fan_in))
        return jax.random.uniform(k, (fan_in, fan_out), f32, -b, b)

    w0 = linear_w(ks[0], NUM_INPUTS, H_IN)
    w1 = linear_w(ks[1], H_IN, H1)
    w2 = linear_w(ks[2], H1, H2)
    w3 = linear_w(ks[3], H2, H3)
    wa = linear_w(ks[4], H3, NUM_OUTPUTS)
    wc = linear_w(ks[5], H3, 1)
    bb = float(1.0 / np.sqrt(H3))
    ba = jax.random.uniform(ks[6], (NUM_OUTPUTS,), f32, -bb, bb)
    bc = jax.random.uniform(ks[7], (1,), f32, -bb, bb)

    # CartPole-style normalization bounds (module takes them as constructor args)
    inp_min = jnp.array([-2.4, -3.0, -0.2095, -1.5], f32)
    inp_max = jnp.array([2.4, 3.0, 0.2095, 1.5], f32)

    return pack_params(w0, w1, w2, w3, wa, ba, wc, bc, inp_min, inp_max)


def init_mems(batch):
    f32 = jnp.float32
    return dict(mem_in=jnp.zeros((batch, H_IN), f32),
                mem1=jnp.zeros((batch, H1), f32),
                mem2=jnp.zeros((batch, H2), f32),
                mem3=jnp.zeros((batch, H3), f32))


if __name__ == "__main__":
    key = jax.random.PRNGKey(0)
    k_param, k_x = jax.random.split(key)

    params = init_params(k_param)

    B, T = 2, 4
    # observations roughly inside [inp_min, inp_max]
    x_seq = jax.random.uniform(k_x, (T, B, NUM_INPUTS), jnp.float32, -1.0, 1.0) * jnp.array(
        [2.4, 3.0, 0.2095, 1.5], jnp.float32)

    # multi-step rollout: the whole T-step loop runs inside one kernel invocation
    mems = init_mems(B)
    val_seq, act_seq, mems = actor_critic_snn_forward(x_seq, params, mems)
    jax.block_until_ready((val_seq, act_seq, mems))
    assert val_seq.shape == (T, B, 1) and act_seq.shape == (T, B, NUM_OUTPUTS)
    assert bool(jnp.all(jnp.isfinite(val_seq))) and bool(jnp.all(jnp.isfinite(act_seq)))
    assert mems["mem_in"].shape == (B, H_IN) and mems["mem3"].shape == (B, H3)
    assert bool(jnp.all(jnp.isfinite(mems["mem1"]))) and bool(jnp.all(jnp.isfinite(mems["mem2"])))

    # single-step call (same semantics as one module.forward); it must reproduce the
    # rollout's first step exactly when started from the same zero state
    val1, act1, mems1 = actor_critic_snn_forward(x_seq[0], params, init_mems(B))
    jax.block_until_ready((val1, act1, mems1))
    assert val1.shape == (B, 1) and act1.shape == (B, NUM_OUTPUTS)
    assert bool(jnp.all(jnp.isfinite(val1))) and bool(jnp.all(jnp.isfinite(act1)))
    assert bool(jnp.allclose(val_seq[0], val1, atol=1e-5))
    assert bool(jnp.allclose(act_seq[0], act1, atol=1e-5))

    print("KERNEL_OK")
</pallas_src>

<mosaic_0001>
module attributes {stable_mosaic.version = 11 : i64} {
  func.func @snn_kernel(%arg0: memref<4x8x8xf32, #tpu.memory_space<vmem>>, %arg1: memref<1x8xf32, #tpu.memory_space<vmem>>, %arg2: memref<1x8xf32, #tpu.memory_space<vmem>>, %arg3: memref<8x512xf32, #tpu.memory_space<vmem>>, %arg4: memref<512x384xbf16, #tpu.memory_space<vmem>>, %arg5: memref<384x640xbf16, #tpu.memory_space<vmem>>, %arg6: memref<256x128xbf16, #tpu.memory_space<vmem>>, %arg7: memref<1x128xf32, #tpu.memory_space<vmem>>, %arg8: memref<8x512xf32, #tpu.memory_space<vmem>>, %arg9: memref<8x384xf32, #tpu.memory_space<vmem>>, %arg10: memref<8x384xf32, #tpu.memory_space<vmem>>, %arg11: memref<8x256xf32, #tpu.memory_space<vmem>>, %arg12: memref<4x8x128xf32, #tpu.memory_space<vmem>>, %arg13: memref<8x512xf32, #tpu.memory_space<vmem>>, %arg14: memref<8x384xf32, #tpu.memory_space<vmem>>, %arg15: memref<8x384xf32, #tpu.memory_space<vmem>>, %arg16: memref<8x256xf32, #tpu.memory_space<vmem>>) attributes {dimension_semantics = [], scalar_prefetch = 0 : i64, scratch_operands = 0 : i64, tpu.core_type = #tpu.core_type<tc>} {
    %c0 = arith.constant 0 : index
    %c0_0 = arith.constant 0 : index
    %0 = vector.load %arg1[%c0, %c0_0] : memref<1x8xf32, #tpu.memory_space<vmem>>, vector<1x8xf32>
    %c0_1 = arith.constant 0 : index
    %c0_2 = arith.constant 0 : index
    %1 = vector.load %arg2[%c0_1, %c0_2] : memref<1x8xf32, #tpu.memory_space<vmem>>, vector<1x8xf32>
    %c0_3 = arith.constant 0 : index
    %c0_4 = arith.constant 0 : index
    %2 = vector.load %arg3[%c0_3, %c0_4] : memref<8x512xf32, #tpu.memory_space<vmem>>, vector<8x512xf32>
    %c0_5 = arith.constant 0 : index
    %c0_6 = arith.constant 0 : index
    %3 = vector.load %arg7[%c0_5, %c0_6] : memref<1x128xf32, #tpu.memory_space<vmem>>, vector<1x128xf32>
    %c0_7 = arith.constant 0 : index
    %c0_8 = arith.constant 0 : index
    %4 = vector.load %arg8[%c0_7, %c0_8] : memref<8x512xf32, #tpu.memory_space<vmem>>, vector<8x512xf32>
    %c0_9 = arith.constant 0 : index
    %c0_10 = arith.constant 0 : index
    %5 = vector.load %arg9[%c0_9, %c0_10] : memref<8x384xf32, #tpu.memory_space<vmem>>, vector<8x384xf32>
    %c0_11 = arith.constant 0 : index
    %c0_12 = arith.constant 0 : index
    %6 = vector.load %arg10[%c0_11, %c0_12] : memref<8x384xf32, #tpu.memory_space<vmem>>, vector<8x384xf32>
    %c0_13 = arith.constant 0 : index
    %c0_14 = arith.constant 0 : index
    %7 = vector.load %arg11[%c0_13, %c0_14] : memref<8x256xf32, #tpu.memory_space<vmem>>, vector<8x256xf32>
    %c0_i32 = arith.constant 0 : i32
    %c4_i32 = arith.constant 4 : i32
    %8 = arith.addi %c0_i32, %c4_i32 : i32
    %c1_i32 = arith.constant 1 : i32
    %9:4 = scf.for %arg17 = %c0_i32 to %8 step %c1_i32 iter_args(%arg18 = %4, %arg19 = %5, %arg20 = %6, %arg21 = %7) -> (vector<8x512xf32>, vector<8x384xf32>, vector<8x384xf32>, vector<8x256xf32>)  : i32 {
      %14 = arith.index_cast %arg17 : i32 to index
      %c0_24 = arith.constant 0 : index
      %c0_25 = arith.constant 0 : index
      %15 = vector.load %arg0[%14, %c0_24, %c0_25] : memref<4x8x8xf32, #tpu.memory_space<vmem>>, vector<1x8x8xf32>
      %16 = vector.shape_cast %15 : vector<1x8x8xf32> to vector<8x8xf32>
      %17 = vector.broadcast %0 : vector<1x8xf32> to vector<8x8xf32>
      %18 = arith.mulf %16, %17 : vector<8x8xf32>
      %19 = vector.broadcast %1 : vector<1x8xf32> to vector<8x8xf32>
      %20 = arith.addf %18, %19 : vector<8x8xf32>
      %21 = vector.extract_strided_slice %20 {offsets = [0, 0], sizes = [8, 1], strides = [1, 1]} : vector<8x8xf32> to vector<8x1xf32>
      %22 = vector.extract_strided_slice %2 {offsets = [0, 0], sizes = [1, 512], strides = [1, 1]} : vector<8x512xf32> to vector<1x512xf32>
      %23 = vector.broadcast %21 : vector<8x1xf32> to vector<8x512xf32>
      %24 = vector.broadcast %22 : vector<1x512xf32> to vector<8x512xf32>
      %25 = arith.mulf %23, %24 : vector<8x512xf32>
      %26 = vector.extract_strided_slice %20 {offsets = [0, 1], sizes = [8, 1], strides = [1, 1]} : vector<8x8xf32> to vector<8x1xf32>
      %27 = vector.extract_strided_slice %2 {offsets = [1, 0], sizes = [1, 512], strides = [1, 1]} : vector<8x512xf32> to vector<1x512xf32>
      %28 = vector.broadcast %26 : vector<8x1xf32> to vector<8x512xf32>
      %29 = vector.broadcast %27 : vector<1x512xf32> to vector<8x512xf32>
      %30 = arith.mulf %28, %29 : vector<8x512xf32>
      %31 = arith.addf %25, %30 : vector<8x512xf32>
      %32 = vector.extract_strided_slice %20 {offsets = [0, 2], sizes = [8, 1], strides = [1, 1]} : vector<8x8xf32> to vector<8x1xf32>
      %33 = vector.extract_strided_slice %2 {offsets = [2, 0], sizes = [1, 512], strides = [1, 1]} : vector<8x512xf32> to vector<1x512xf32>
      %34 = vector.broadcast %32 : vector<8x1xf32> to vector<8x512xf32>
      %35 = vector.broadcast %33 : vector<1x512xf32> to vector<8x512xf32>
      %36 = arith.mulf %34, %35 : vector<8x512xf32>
      %37 = arith.addf %31, %36 : vector<8x512xf32>
      %38 = vector.extract_strided_slice %20 {offsets = [0, 3], sizes = [8, 1], strides = [1, 1]} : vector<8x8xf32> to vector<8x1xf32>
      %39 = vector.extract_strided_slice %2 {offsets = [3, 0], sizes = [1, 512], strides = [1, 1]} : vector<8x512xf32> to vector<1x512xf32>
      %40 = vector.broadcast %38 : vector<8x1xf32> to vector<8x512xf32>
      %41 = vector.broadcast %39 : vector<1x512xf32> to vector<8x512xf32>
      %42 = arith.mulf %40, %41 : vector<8x512xf32>
      %43 = arith.addf %37, %42 : vector<8x512xf32>
      %cst = arith.constant 1.000000e+00 : f32
      %44 = vector.broadcast %cst : f32 to vector<8x512xf32>
      %45 = arith.cmpf ogt, %arg18, %44 : vector<8x512xf32>
      %46 = arith.extui %45 : vector<8x512xi1> to vector<8x512xi32>
      %47 = arith.sitofp %46 : vector<8x512xi32> to vector<8x512xf32>
      %cst_26 = arith.constant 0.949999988 : f32
      %48 = vector.broadcast %cst_26 : f32 to vector<8x512xf32>
      %49 = arith.mulf %48, %arg18 : vector<8x512xf32>
      %50 = arith.addf %49, %43 : vector<8x512xf32>
      %cst_27 = arith.constant 1.000000e+00 : f32
      %51 = vector.broadcast %cst_27 : f32 to vector<8x512xf32>
      %52 = arith.mulf %47, %51 : vector<8x512xf32>
      %53 = arith.subf %50, %52 : vector<8x512xf32>
      %cst_28 = arith.constant 1.000000e+00 : f32
      %54 = vector.broadcast %cst_28 : f32 to vector<8x512xf32>
      %55 = arith.cmpf ogt, %53, %54 : vector<8x512xf32>
      %56 = arith.extui %55 : vector<8x512xi1> to vector<8x512xi32>
      %57 = arith.sitofp %56 : vector<8x512xi32> to vector<8x512xf32>
      %58 = arith.truncf %57 : vector<8x512xf32> to vector<8x512xbf16>
      %c0_29 = arith.constant 0 : index
      %c0_30 = arith.constant 0 : index
      %59 = vector.load %arg4[%c0_29, %c0_30] : memref<512x384xbf16, #tpu.memory_space<vmem>>, vector<512x384xbf16>
      %cst_31 = arith.constant dense<0.000000e+00> : vector<8x384xf32>
      %60 = tpu.matmul %58, %59, %cst_31 {dimension_numbers = #tpu.dot_dimension_numbers<[1], [0], [0], [1], [0, 0, 1, 1], [], []>} : vector<8x512xbf16>, vector<512x384xbf16>, vector<8x384xf32> -> vector<8x384xf32>
      %cst_32 = arith.constant 1.000000e+00 : f32
      %61 = vector.broadcast %cst_32 : f32 to vector<8x384xf32>
      %62 = arith.cmpf ogt, %arg19, %61 : vector<8x384xf32>
      %63 = arith.extui %62 : vector<8x384xi1> to vector<8x384xi32>
      %64 = arith.sitofp %63 : vector<8x384xi32> to vector<8x384xf32>
      %cst_33 = arith.constant 0.949999988 : f32
      %65 = vector.broadcast %cst_33 : f32 to vector<8x384xf32>
      %66 = arith.mulf %65, %arg19 : vector<8x384xf32>
      %67 = arith.addf %66, %60 : vector<8x384xf32>
      %cst_34 = arith.constant 1.000000e+00 : f32
      %68 = vector.broadcast %cst_34 : f32 to vector<8x384xf32>
      %69 = arith.mulf %64, %68 : vector<8x384xf32>
      %70 = arith.subf %67, %69 : vector<8x384xf32>
      %cst_35 = arith.constant 1.000000e+00 : f32
      %71 = vector.broadcast %cst_35 : f32 to vector<8x384xf32>
      %72 = arith.cmpf ogt, %70, %71 : vector<8x384xf32>
      %73 = arith.extui %72 : vector<8x384xi1> to vector<8x384xi32>
      %74 = arith.sitofp %73 : vector<8x384xi32> to vector<8x384xf32>
      %75 = arith.truncf %74 : vector<8x384xf32> to vector<8x384xbf16>
      %c0_36 = arith.constant 0 : index
      %c0_37 = arith.constant 0 : index
      %76 = vector.load %arg5[%c0_36, %c0_37] : memref<384x640xbf16, #tpu.memory_space<vmem>>, vector<384x640xbf16>
      %cst_38 = arith.constant dense<0.000000e+00> : vector<8x640xf32>
      %77 = tpu.matmul %75, %76, %cst_38 {dimension_numbers = #tpu.dot_dimension_numbers<[1], [0], [0], [1], [0, 0, 1, 1], [], []>} : vector<8x384xbf16>, vector<384x640xbf16>, vector<8x640xf32> -> vector<8x640xf32>
      %78 = vector.extract_strided_slice %77 {offsets = [0, 0], sizes = [8, 384], strides = [1, 1]} : vector<8x640xf32> to vector<8x384xf32>
      %cst_39 = arith.constant 1.000000e+00 : f32
      %79 = vector.broadcast %cst_39 : f32 to vector<8x384xf32>
      %80 = arith.cmpf ogt, %arg20, %79 : vector<8x384xf32>
      %81 = arith.extui %80 : vector<8x384xi1> to vector<8x384xi32>
      %82 = arith.sitofp %81 : vector<8x384xi32> to vector<8x384xf32>
      %cst_40 = arith.constant 0.949999988 : f32
      %83 = vector.broadcast %cst_40 : f32 to vector<8x384xf32>
      %84 = arith.mulf %83, %arg20 : vector<8x384xf32>
      %85 = arith.addf %84, %78 : vector<8x384xf32>
      %cst_41 = arith.constant 1.000000e+00 : f32
      %86 = vector.broadcast %cst_41 : f32 to vector<8x384xf32>
      %87 = arith.mulf %82, %86 : vector<8x384xf32>
      %88 = arith.subf %85, %87 : vector<8x384xf32>
      %89 = vector.extract_strided_slice %77 {offsets = [0, 384], sizes = [8, 256], strides = [1, 1]} : vector<8x640xf32> to vector<8x256xf32>
      %cst_42 = arith.constant 1.000000e+00 : f32
      %90 = vector.broadcast %cst_42 : f32 to vector<8x256xf32>
      %91 = arith.cmpf ogt, %arg21, %90 : vector<8x256xf32>
      %92 = arith.extui %91 : vector<8x256xi1> to vector<8x256xi32>
      %93 = arith.sitofp %92 : vector<8x256xi32> to vector<8x256xf32>
      %cst_43 = arith.constant 0.949999988 : f32
      %94 = vector.broadcast %cst_43 : f32 to vector<8x256xf32>
      %95 = arith.mulf %94, %arg21 : vector<8x256xf32>
      %96 = arith.addf %95, %89 : vector<8x256xf32>
      %cst_44 = arith.constant 1.000000e+00 : f32
      %97 = vector.broadcast %cst_44 : f32 to vector<8x256xf32>
      %98 = arith.mulf %93, %97 : vector<8x256xf32>
      %99 = arith.subf %96, %98 : vector<8x256xf32>
      %cst_45 = arith.constant 1.000000e+00 : f32
      %100 = vector.broadcast %cst_45 : f32 to vector<8x256xf32>
      %101 = arith.cmpf ogt, %99, %100 : vector<8x256xf32>
      %102 = arith.extui %101 : vector<8x256xi1> to vector<8x256xi32>
      %103 = arith.sitofp %102 : vector<8x256xi32> to vector<8x256xf32>
      %104 = arith.truncf %103 : vector<8x256xf32> to vector<8x256xbf16>
      %c0_46 = arith.constant 0 : index
      %c0_47 = arith.constant 0 : index
      %105 = vector.load %arg6[%c0_46, %c0_47] : memref<256x128xbf16, #tpu.memory_space<vmem>>, vector<256x128xbf16>
      %cst_48 = arith.constant dense<0.000000e+00> : vector<8x128xf32>
      %106 = tpu.matmul %104, %105, %cst_48 {dimension_numbers = #tpu.dot_dimension_numbers<[1], [0], [0], [1], [0, 0, 1, 1], [], []>} : vector<8x256xbf16>, vector<256x128xbf16>, vector<8x128xf32> -> vector<8x128xf32>
      %107 = vector.broadcast %3 : vector<1x128xf32> to vector<8x128xf32>
      %108 = arith.addf %106, %107 : vector<8x128xf32>
      %109 = arith.index_cast %arg17 : i32 to index
      %c0_49 = arith.constant 0 : index
      %c0_50 = arith.constant 0 : index
      %110 = vector.load %arg12[%109, %c0_49, %c0_50] : memref<4x8x128xf32, #tpu.memory_space<vmem>>, vector<1x8x128xf32>
      %111 = vector.shape_cast %110 : vector<1x8x128xf32> to vector<8x128xf32>
      %112 = vector.shape_cast %108 : vector<8x128xf32> to vector<1x8x128xf32>
      tpu.vector_store %arg12[%109, %c0_49, %c0_50], %112 {strides = array<i32>} : memref<4x8x128xf32, #tpu.memory_space<vmem>>, vector<1x8x128xf32>,
      scf.yield %53, %70, %88, %99 : vector<8x512xf32>, vector<8x384xf32>, vector<8x384xf32>, vector<8x256xf32>
    }
    %c4_i32_15 = arith.constant 4 : i32
    %c0_16 = arith.constant 0 : index
    %c0_17 = arith.constant 0 : index
    %10 = vector.load %arg13[%c0_16, %c0_17] : memref<8x512xf32, #tpu.memory_space<vmem>>, vector<8x512xf32>
    tpu.vector_store %arg13[%c0_16, %c0_17], %9#0 {strides = array<i32>} : memref<8x512xf32, #tpu.memory_space<vmem>>, vector<8x512xf32>,
    %c0_18 = arith.constant 0 : index
    %c0_19 = arith.constant 0 : index
    %11 = vector.load %arg14[%c0_18, %c0_19] : memref<8x384xf32, #tpu.memory_space<vmem>>, vector<8x384xf32>
    tpu.vector_store %arg14[%c0_18, %c0_19], %9#1 {strides = array<i32>} : memref<8x384xf32, #tpu.memory_space<vmem>>, vector<8x384xf32>,
    %c0_20 = arith.constant 0 : index
    %c0_21 = arith.constant 0 : index
    %12 = vector.load %arg15[%c0_20, %c0_21] : memref<8x384xf32, #tpu.memory_space<vmem>>, vector<8x384xf32>
    tpu.vector_store %arg15[%c0_20, %c0_21], %9#2 {strides = array<i32>} : memref<8x384xf32, #tpu.memory_space<vmem>>, vector<8x384xf32>,
    %c0_22 = arith.constant 0 : index
    %c0_23 = arith.constant 0 : index
    %13 = vector.load %arg16[%c0_22, %c0_23] : memref<8x256xf32, #tpu.memory_space<vmem>>, vector<8x256xf32>
    tpu.vector_store %arg16[%c0_22, %c0_23], %9#3 {strides = array<i32>} : memref<8x256xf32, #tpu.memory_space<vmem>>, vector<8x256xf32>,
    return
  }
}

</mosaic_0001>

<bundles_post_ra>
// kernel: tpu_custom_call.1
= control target key start
LH: loop header
LB: loop body
LE: loop exit
PB: predicated region body
PF: predicated region fallthrough
CT: control target
= control target key end

     0   :  { %s4846_s0 = inlined_call_operand.hbm [shape: f32[4,8,8], index: 0, kind: input, shape index: {}]   ;;  %s4847_s1 = inlined_call_operand.hbm [shape: f32[1,8], index: 1, kind: input, shape index: {}]   ;;  %s4848_s2 = inlined_call_operand.vmem [shape: f32[1,8], index: 2, kind: input, shape index: {}]   ;;  %s4849_s3 = inlined_call_operand.hbm [shape: f32[8,512], index: 3, kind: input, shape index: {}]   ;;  %s4850_s4 = inlined_call_operand.hbm [shape: bf16[512,384], index: 4, kind: input, shape index: {}]   ;;  %s4851_s5 = inlined_call_operand.hbm [shape: bf16[384,640], index: 5, kind: input, shape index: {}]   ;;  %s4852_s6 = inlined_call_operand.hbm [shape: bf16[256,128], index: 6, kind: input, shape index: {}]   ;;  %s4853_s7 = inlined_call_operand.vmem [shape: f32[1,128], index: 7, kind: input, shape index: {}]   ;;  %s4854_s8 = inlined_call_operand.hbm [shape: f32[8,512], index: 8, kind: input, shape index: {}]   ;;  %s4855_s9 = inlined_call_operand.hbm [shape: f32[8,384], index: 9, kind: input, shape index: {}]   ;;  %s4856_s10 = inlined_call_operand.hbm [shape: f32[8,384], index: 10, kind: input, shape index: {}]   ;;  %s4857_s11 = inlined_call_operand.hbm [shape: f32[8,256], index: 11, kind: input, shape index: {}]   ;;  %s4858_s12 = inlined_call_operand.hbm [shape: f32[4,8,128], index: 12, kind: output, shape index: {0}]   ;;  %s4859_s13 = inlined_call_operand.hbm [shape: f32[8,512], index: 13, kind: output, shape index: {1}]   ;;  %s4860_s14 = inlined_call_operand.hbm [shape: f32[8,384], index: 14, kind: output, shape index: {2}]   ;;  %s4861_s15 = inlined_call_operand.hbm [shape: f32[8,384], index: 15, kind: output, shape index: {3}]   ;;  %s4862_s16 = inlined_call_operand.hbm [shape: f32[8,256], index: 16, kind: output, shape index: {4}]  }
   0x1   :  { %4863 = sst [smem:[#allocation35_spill]] %s4846_s0 }
   0x2   :  { %22 = vsyncpa [#allocation3], 0 }
   0x3   :  { %23 = vsyncpa [#allocation6], 0 }
   0x4   :  { %24 = vsyncpa [#allocation9], 0 }
   0x5   :  { %25 = vsyncpa [#allocation12], 0 }
   0x6   :  { %26 = vsyncpa [#allocation15], 0 }
   0x7   :  { %27 = vsyncpa [#allocation18], 0 }
   0x8   :  { %28 = vsyncpa [#allocation4], 0 }
   0x9   :  { %29 = vsyncpa [#allocation21], 0  ;;  %s49_s23 = sshll.u32 %s4847_s1, 4  ;;  %s50_s23 = int_to_ptr.hbm [resolvable:$true] %s49_s23 }
   0xa   :  { %30 = vsyncpa [#allocation24], 0  ;;  %s4331_s24 = smov [#allocation5]   ;;  %s72_s28 = sshll.u32 %s4850_s4, 4  ;;  %s73_s28 = int_to_ptr.hbm [resolvable:$true] %s72_s28 }
   0xb   :  { %s51_s25 = sshll.u32 %s4331_s24, 4  ;;  %s4332_s29 = smov [#allocation8]   ;;  %s52_s25 = int_to_ptr.vmem [resolvable:$true] %s51_s25 }
   0xc   :  { %54 = dma.hbm_to_vmem [thread:$0]  %s50_s23, 16, %s52_s25, [#allocation6]  }
   0xd   :  { %s74_s30 = sshll.u32 %s4332_s29, 4  ;;  %s4333_s0 = smov 192   ;;  %s75_s30 = int_to_ptr.vmem [resolvable:$true] %s74_s30 }
   0xe   :  { %s4334_s17 = smov 12   ;;  %s98_s1 = sshll.u32 %s4852_s6, 4  ;;  %s99_s1 = int_to_ptr.hbm [resolvable:$true] %s98_s1 }
   0xf   :  { %80 = dma.hbm_to_vmem [thread:$0]  %s73_s28, 12288, %s75_s30, [#allocation9], %s4333_s0, %s4333_s0, %s4334_s17  }
  0x10   :  { %s4335_s20 = smov [#allocation11]   ;;  %s125_s4 = sshll.u32 %s4855_s9, 4  ;;  %s126_s4 = int_to_ptr.hbm [resolvable:$true] %s125_s4 }
  0x11   :  { %s100_s21 = sshll.u32 %s4335_s20, 4  ;;  %s4336_s23 = smov 64   ;;  %s101_s21 = int_to_ptr.vmem [resolvable:$true] %s100_s21 }
  0x12   :  { %s4337_s25 = smov 4   ;;  %s4338_s26 = smov [#allocation14]  }
  0x13   :  { %106 = dma.hbm_to_vmem [thread:$0]  %s99_s1, 2048, %s101_s21, [#allocation12], %s4336_s23, %s4336_s23, %s4337_s25  }
  0x14   :  { %s127_s27 = sshll.u32 %s4338_s26, 4  ;;  %s4864_s30 = sld [smem:[#allocation35_spill]]  ;;  %s128_s27 = int_to_ptr.vmem [resolvable:$true] %s127_s27 }
  0x15   :  { %130 = dma.hbm_to_vmem [thread:$0]  %s126_s4, 384, %s128_s27, [#allocation15]  }
  0x16   :  { %s4339_s6 = smov [#allocation2]   ;;  %s62_s9 = sshll.u32 %s4849_s3, 4  ;;  %s63_s9 = int_to_ptr.hbm [resolvable:$true] %s62_s9 }
  0x17   :  { %s37_s17 = sshll.u32 %s4339_s6, 4  ;;  %s4340_s20 = smov 128   ;;  %s38_s17 = int_to_ptr.vmem [resolvable:$true] %s37_s17 }
  0x18   :  { %s4341_s22 = smov 8   ;;  %s4342_s1 = smov [#allocation7]  }
  0x19   :  { %s64_s21 = sshll.u32 %s4342_s1, 4  ;;  %s85_s4 = sshll.u32 %s4851_s5, 4  ;;  %s65_s21 = int_to_ptr.vmem [resolvable:$true] %s64_s21  ;;  %s86_s4 = int_to_ptr.hbm [resolvable:$true] %s85_s4 }
  0x1a   :  { %s35_s0 = sshll.u32 %s4864_s30, 4  ;;  %s4343_s25 = smov [#allocation10]   ;;  %s36_s0 = int_to_ptr.hbm [resolvable:$true] %s35_s0 }
  0x1b   :  { %43 = dma.hbm_to_vmem [thread:$0]  %s36_s0, 512, %s38_s17, [#allocation3], %s4340_s20, %s4340_s20, %s4341_s22  }
  0x1c   :  { %67 = dma.hbm_to_vmem [thread:$0]  %s63_s9, 512, %s65_s21, [#allocation6]  }
  0x1d   :  { %s87_s26 = sshll.u32 %s4343_s25, 4  ;;  %s114_s29 = sshll.u32 %s4854_s8, 4  ;;  %s88_s26 = int_to_ptr.vmem [resolvable:$true] %s87_s26  ;;  %s115_s29 = int_to_ptr.hbm [resolvable:$true] %s114_s29 }
  0x1e   :  { %s4344_s28 = smov 320   ;;  %s4345_s30 = smov 20  }
  0x1f   :  { %93 = dma.hbm_to_vmem [thread:$0]  %s86_s4, 15360, %s88_s26, [#allocation9], %s4344_s28, %s4344_s28, %s4345_s30  }
  0x20   :  { %s4346_s0 = smov [#allocation13]   ;;  %s136_s5 = sshll.u32 %s4856_s10, 4  ;;  %s137_s5 = int_to_ptr.hbm [resolvable:$true] %s136_s5 }
  0x21   :  { %s116_s6 = sshll.u32 %s4346_s0, 4  ;;  %s147_s1 = sshll.u32 %s4857_s11, 4  ;;  %s117_s6 = int_to_ptr.vmem [resolvable:$true] %s116_s6  ;;  %s148_s1 = int_to_ptr.hbm [resolvable:$true] %s147_s1 }
  0x22   :  { %119 = dma.hbm_to_vmem [thread:$0]  %s115_s29, 512, %s117_s6, [#allocation12]  }
  0x23   :  { %s4347_s21 = smov [#allocation16]   ;;  %s4348_s8 = smov [#allocation17]  }
  0x24   :  { %s138_s24 = sshll.u32 %s4347_s21, 4  ;;  %s149_s23 = sshll.u32 %s4348_s8, 4  ;;  %s139_s24 = int_to_ptr.vmem [resolvable:$true] %s138_s24  ;;  %s150_s23 = int_to_ptr.vmem [resolvable:$true] %s149_s23 }
  0x25   :  { %141 = dma.hbm_to_vmem [thread:$0]  %s137_s5, 384, %s139_s24, [#allocation15]  }
  0x26   :  { %152 = dma.hbm_to_vmem [thread:$0]  %s148_s1, 256, %s150_s23, [#allocation18]  }
  0x27   :  { %4261 = dma.done.wait [#allocation3], 512  }
  0x28   :  { %4262 = vsyncadd [#allocation3], 4294966784 }
  0x29   :  { %4263 = dma.done.wait [#allocation6], 528  }
  0x2a   :  { %4264 = vsyncadd [#allocation6], 4294966768 }
  0x2b   :  { %4265 = dma.done.wait [#allocation9], 27648  }
  0x2c   :  { %4266 = vsyncadd [#allocation9], 4294939648 }
  0x2d   :  { %4267 = dma.done.wait [#allocation12], 2560  }
  0x2e   :  { %4268 = vsyncadd [#allocation12], 4294964736 }
  0x2f   :  { %4269 = dma.done.wait [#allocation15], 768  }
  0x30   :  { %4270 = vsyncadd [#allocation15], 4294966528 }
  0x31   :  { %4271 = dma.done.wait [#allocation18], 256  }
  0x32   :  { %4272 = vsyncadd [#allocation18], 4294967040  ;;  %v4478_v0 = vld [vmem:[#allocation5] sm:$0x1]  ;;  %v4485_v2 = vld [vmem:[#allocation7] sm:$0xff] }
  0x33   :  { %v4483_v1 = vld [vmem:[%s4848_s2] sm:$0x1]  ;;  %v4487_v3 = vld [vmem:[#allocation7 + $0x8] sm:$0xff]  ;;  %v4489_v4 = vld [vmem:[#allocation7 + $0x10] sm:$0xff]  ;;  %s4522_s2 = smov 0  }
  0x34   :  { %v4491_v5 = vld [vmem:[#allocation7 + $0x18] sm:$0xff]  ;;  %v200_v7 = vld [vmem:[#allocation13] sm:$0xff]   ;;  %v201_v8 = vld [vmem:[#allocation13 + $0x8] sm:$0xff]  }
  0x35   :  { %v4496_v6 = vld [vmem:[%s4853_s7] sm:$0x1]  ;;  %v202_v9 = vld [vmem:[#allocation13 + $0x10] sm:$0xff]   ;;  %v204_v11 = vld [vmem:[#allocation14] sm:$0xff]  }
  0x36   :  { %v203_v10 = vld [vmem:[#allocation13 + $0x18] sm:$0xff]   ;;  %v205_v12 = vld [vmem:[#allocation14 + $0x8] sm:$0xff]   ;;  %v206_v13 = vld [vmem:[#allocation14 + $0x10] sm:$0xff]  }
  0x37   :  { %v207_v14 = vld [vmem:[#allocation16] sm:$0xff]   ;;  %v208_v15 = vld [vmem:[#allocation16 + $0x8] sm:$0xff]   ;;  %v209_v16 = vld [vmem:[#allocation16 + $0x10] sm:$0xff]  }
  0x38   :  { %v210_v17 = vld [vmem:[#allocation17] sm:$0xff]   ;;  %v211_v18 = vld [vmem:[#allocation17 + $0x8] sm:$0xff]  }
  0x39 LB: > { %v2566_v19 = vld [vmem:[#allocation8 + $0xa8] sm:$0xf]  ;;  %v4349_v20 = vmov 0   ;;  %v234_v21 = vperm.slane %v4478_v0, 0  ;;  %v4350_v22 = vmov 2   ;;  %s2471_s7 = sshll.u32 %s4329_s2, 3  ;;  %s4329_s2 = sphi %s4522_s2, %s217_s2   ;;  %v4325_v7 = vphi %v200_v7, %v4902_v7   ;;  %v4321_v8 = vphi %v201_v8, %v4901_v8   ;;  %v4317_v9 = vphi %v202_v9, %v4900_v9   ;;  %v4313_v10 = vphi %v203_v10, %v4899_v10   ;;  %v4309_v11 = vphi %v204_v11, %v4898_v11   ;;  %v4305_v12 = vphi %v205_v12, %v4897_v12   ;;  %v4301_v13 = vphi %v206_v13, %v4896_v13   ;;  %v4297_v14 = vphi %v207_v14, %v4895_v14   ;;  %v4293_v15 = vphi %v208_v15, %v4894_v15   ;;  %v4289_v16 = vphi %v209_v16, %v4893_v16   ;;  %v4285_v17 = vphi %v210_v17, %v4892_v17   ;;  %v4281_v18 = vphi %v211_v18, %v4891_v18  }
  0x3a   : > { %3844 = vset.pattern.permute.xlu0 %v4349_v20  ;;  %3846 = vset.pattern.permute.xlu1 %v4350_v22  ;;  %v3501_v23 = vld [vmem:[#allocation8 + $0xb0] sm:$0xf0]  ;;  %v2662_v24 = vld [vmem:[#allocation8 + $0x168] sm:$0xf]  ;;  %v238_v28 = vperm.slane %v4483_v1, 0  ;;  %s231_s26 = scalar_lea.vmem [#allocation2], %s2471_s7 }
  0x3b   : > { %v2567_v25 = vor.u32 %v3501_v23, %v2566_v19  ;;  %v3525_v26 = vld [vmem:[#allocation8 + $0x170] sm:$0xf0]  ;;  %v2758_v27 = vld [vmem:[#allocation8 + $0x228] sm:$0xf]  ;;  %v232_v32 = vld [vmem:[%s231_s26] sm:$0xff]  ;;  %vm302_vm0 = vcmp.gt.f32.partialorder %v4325_v7, 1.0 }
  0x3c   : > { %v2663_v29 = vor.u32 %v3525_v26, %v2662_v24  ;;  %v3549_v30 = vld [vmem:[#allocation8 + $0x230] sm:$0xf0]  ;;  %v2854_v31 = vld [vmem:[#allocation8 + $0x2e8] sm:$0xf]  ;;  %v2554_v35 = vld [vmem:[#allocation8 + $0x90] sm:$0xf]  ;;  %v236_v36 = vmul.f32 %v234_v21, %v232_v32 }
  0x3d   : > { %982 = vmatpush.bf16.msra.mxu0 %v2567_v25  ;;  %v2759_v33 = vor.u32 %v3549_v30, %v2758_v27  ;;  %v3573_v34 = vld [vmem:[#allocation8 + $0x2f0] sm:$0xf0]  ;;  %v3498_v38 = vld [vmem:[#allocation8 + $0x98] sm:$0xf0]  ;;  %v2650_v39 = vld [vmem:[#allocation8 + $0x150] sm:$0xf] }
  0x3e   : > { %995 = vmatpush.bf16.msra.mxu1 %v2663_v29  ;;  %v2855_v37 = vor.u32 %v3573_v34, %v2854_v31  ;;  %v3522_v40 = vld [vmem:[#allocation8 + $0x158] sm:$0xf0]  ;;  %v2555_v41 = vor.u32 %v3498_v38, %v2554_v35  ;;  %v2746_v43 = vld [vmem:[#allocation8 + $0x210] sm:$0xf]  ;;  %v240_v46 = vadd.f32 %v238_v28, %v236_v36  ;;  %v2542_v49 = vld [vmem:[#allocation8 + $0x78] sm:$0xf] }
  0x3f   : > { %1008 = vmatpush.bf16.msra.mxu2 %v2759_v33  ;;  %v2651_v42 = vor.u32 %v3522_v40, %v2650_v39  ;;  %v3546_v44 = vld [vmem:[#allocation8 + $0x218] sm:$0xf0]  ;;  %v2842_v45 = vld [vmem:[#allocation8 + $0x2d0] sm:$0xf]  ;;  %v3495_v50 = vld [vmem:[#allocation8 + $0x80] sm:$0xf0] }
  0x40   : > { %1021 = vmatpush.bf16.msra.mxu3 %v2855_v37  ;;  %v2747_v47 = vor.u32 %v3546_v44, %v2746_v43  ;;  %v3570_v48 = vld [vmem:[#allocation8 + $0x2d8] sm:$0xf0]  ;;  %v2543_v52 = vor.u32 %v3495_v50, %v2542_v49  ;;  %v2638_v53 = vld [vmem:[#allocation8 + $0x138] sm:$0xf]  ;;  %v3519_v54 = vld [vmem:[#allocation8 + $0x140] sm:$0xf0]  ;;  %243 = vperm.xlu0 %3844, %v240_v46  }
  0x41   : > { %983 = vmatpush.bf16.msra.mxu0 %v2555_v41  ;;  %v2843_v51 = vor.u32 %v3570_v48, %v2842_v45  ;;  %v2734_v55 = vld [vmem:[#allocation8 + $0x1f8] sm:$0xf]  ;;  %271 = vperm.xlu1 %3846, %v240_v46   ;;  %v3543_v56 = vld [vmem:[#allocation8 + $0x200] sm:$0xf0]  ;;  %v2639_v59 = vor.u32 %v3519_v54, %v2638_v53  ;;  %v2530_v61 = vld [vmem:[#allocation8 + $0x60] sm:$0xf] }
  0x42   : > { %v2830_v57 = vld [vmem:[#allocation8 + $0x2b8] sm:$0xf]  ;;  %v3567_v58 = vld [vmem:[#allocation8 + $0x2c0] sm:$0xf0]  ;;  %996 = vmatpush.bf16.msra.mxu1 %v2651_v42  ;;  %v2735_v60 = vor.u32 %v3543_v56, %v2734_v55  ;;  %v3492_v62 = vld [vmem:[#allocation8 + $0x68] sm:$0xf0] }
  0x43   : > { %1009 = vmatpush.bf16.msra.mxu2 %v2747_v47  ;;  %v2831_v63 = vor.u32 %v3567_v58, %v2830_v57  ;;  %v2626_v19 = vld [vmem:[#allocation8 + $0x120] sm:$0xf]  ;;  %v3516_v20 = vld [vmem:[#allocation8 + $0x128] sm:$0xf0]  ;;  %v2531_v21 = vor.u32 %v3492_v62, %v2530_v61  ;;  %v2518_v26 = vld [vmem:[#allocation8 + $0x48] sm:$0xf] }
  0x44   : > { %1022 = vmatpush.bf16.msra.mxu3 %v2843_v51  ;;  %v2722_v22 = vld [vmem:[#allocation8 + $0x1e0] sm:$0xf]  ;;  %v3540_v23 = vld [vmem:[#allocation8 + $0x1e8] sm:$0xf0]  ;;  %v3489_v27 = vld [vmem:[#allocation8 + $0x50] sm:$0xf0]  ;;  %v2627_v28 = vor.u32 %v3516_v20, %v2626_v19 }
  0x45   : > { %984 = vmatpush.bf16.msra.mxu0 %v2543_v52  ;;  %v2818_v24 = vld [vmem:[#allocation8 + $0x2a0] sm:$0xf]  ;;  %v3564_v25 = vld [vmem:[#allocation8 + $0x2a8] sm:$0xf0]  ;;  %v2723_v29 = vor.u32 %v3540_v23, %v2722_v22  ;;  %v2614_v30 = vld [vmem:[#allocation8 + $0x108] sm:$0xf]  ;;  %v2519_v33 = vor.u32 %v3489_v27, %v2518_v26 }
  0x46   : > { %997 = vmatpush.bf16.msra.mxu1 %v2639_v59  ;;  %v3513_v31 = vld [vmem:[#allocation8 + $0x110] sm:$0xf0]  ;;  %v2819_v32 = vor.u32 %v3564_v25, %v2818_v24  ;;  %v2710_v34 = vld [vmem:[#allocation8 + $0x1c8] sm:$0xf]  ;;  %v4351_v37 = vmov 1   ;;  %v4352_v38 = vmov 3  }
  0x47   : > { %1010 = vmatpush.bf16.msra.mxu2 %v2735_v60  ;;  %v3537_v35 = vld [vmem:[#allocation8 + $0x1d0] sm:$0xf0]  ;;  %v2806_v36 = vld [vmem:[#allocation8 + $0x288] sm:$0xf]  ;;  %v2506_v40 = vld [vmem:[#allocation8 + $0x30] sm:$0xf]  ;;  %v2615_v42 = vor.u32 %v3513_v31, %v2614_v30 }
  0x48   : > { %1023 = vmatpush.bf16.msra.mxu3 %v2831_v63  ;;  %3845 = vset.pattern.permute.xlu0 %v4351_v37  ;;  %v3561_v39 = vld [vmem:[#allocation8 + $0x290] sm:$0xf0]  ;;  %v3486_v41 = vld [vmem:[#allocation8 + $0x38] sm:$0xf0]  ;;  %v2711_v43 = vor.u32 %v3537_v35, %v2710_v34  ;;  %v2602_v44 = vld [vmem:[#allocation8 + $0xf0] sm:$0xf] }
  0x49   : > { %985 = vmatpush.bf16.msra.mxu0 %v2531_v21  ;;  %3847 = vset.pattern.permute.xlu1 %v4352_v38  ;;  %v3510_v45 = vld [vmem:[#allocation8 + $0xf8] sm:$0xf0]  ;;  %v2807_v47 = vor.u32 %v3561_v39, %v2806_v36  ;;  %v2507_v48 = vor.u32 %v3486_v41, %v2506_v40  ;;  %v2698_v49 = vld [vmem:[#allocation8 + $0x1b0] sm:$0xf]  ;;  %v2494_v53 = vld [vmem:[#allocation8 + $0x18] sm:$0xf] }
  0x4a   : > { %255 = vperm.xlu0 %3845, %v240_v46   ;;  %287 = vperm.xlu1 %3847, %v240_v46   ;;  %v3534_v50 = vld [vmem:[#allocation8 + $0x1b8] sm:$0xf0]  ;;  %v2794_v51 = vld [vmem:[#allocation8 + $0x270] sm:$0xf]  ;;  %v3483_v54 = vld [vmem:[#allocation8 + $0x20] sm:$0xf0]  ;;  %v2603_v55 = vor.u32 %v3510_v45, %v2602_v44 }
  0x4b   : > { %998 = vmatpush.bf16.msra.mxu1 %v2627_v28  ;;  %1011 = vmatpush.bf16.msra.mxu2 %v2723_v29  ;;  %v3558_v52 = vld [vmem:[#allocation8 + $0x278] sm:$0xf0]  ;;  %v2699_v46 = vor.u32 %v3534_v50, %v2698_v49  ;;  %v2590_v56 = vld [vmem:[#allocation8 + $0xd8] sm:$0xf]  ;;  %v3507_v57 = vld [vmem:[#allocation8 + $0xe0] sm:$0xf0]  ;;  %v2495_v59 = vor.u32 %v3483_v54, %v2494_v53 }
  0x4c   : > { %1024 = vmatpush.bf16.msra.mxu3 %v2819_v32  ;;  %v2795_v58 = vor.u32 %v3558_v52, %v2794_v51  ;;  %v2686_v60 = vld [vmem:[#allocation8 + $0x198] sm:$0xf]  ;;  %v3531_v61 = vld [vmem:[#allocation8 + $0x1a0] sm:$0xf0]  ;;  %v2482_v19 = vld [vmem:[#allocation8] sm:$0xf]  ;;  %v2591_v23 = vor.u32 %v3507_v57, %v2590_v56 }
  0x4d   : > { %986 = vmatpush.bf16.msra.mxu0 %v2519_v33  ;;  %v2782_v62 = vld [vmem:[#allocation8 + $0x258] sm:$0xf]  ;;  %v3555_v63 = vld [vmem:[#allocation8 + $0x260] sm:$0xf0]  ;;  %v3480_v20 = vld [vmem:[#allocation8 + $0x8] sm:$0xf0]  ;;  %v2687_v24 = vor.u32 %v3531_v61, %v2686_v60 }
  0x4e   : > { %v3500_v21 = vld [vmem:[#allocation8 + $0xac] sm:$0xf]  ;;  %v2568_v22 = vld [vmem:[#allocation8 + $0xb4] sm:$0xf0]  ;;  %v2578_v25 = vld [vmem:[#allocation8 + $0xc0] sm:$0xf]  ;;  %v2783_v28 = vor.u32 %v3555_v63, %v2782_v62  ;;  %v2483_v29 = vor.u32 %v3480_v20, %v2482_v19 }
  0x4f   : > { %999 = vmatpush.bf16.msra.mxu1 %v2615_v42  ;;  %1012 = vmatpush.bf16.msra.mxu2 %v2711_v43  ;;  %v3504_v26 = vld [vmem:[#allocation8 + $0xc8] sm:$0xf0]  ;;  %v2674_v27 = vld [vmem:[#allocation8 + $0x180] sm:$0xf]  ;;  %v2571_v33 = vor.u32 %v3500_v21, %v2568_v22  ;;  %v2664_v35 = vld [vmem:[#allocation8 + $0x174] sm:$0xf0] }
  0x50   : > { %1025 = vmatpush.bf16.msra.mxu3 %v2807_v47  ;;  %v3528_v30 = vld [vmem:[#allocation8 + $0x188] sm:$0xf0]  ;;  %v2770_v31 = vld [vmem:[#allocation8 + $0x240] sm:$0xf]  ;;  %v2760_v37 = vld [vmem:[#allocation8 + $0x234] sm:$0xf0]  ;;  %v2579_v40 = vor.u32 %v3504_v26, %v2578_v25 }
  0x51   : > { %987 = vmatpush.bf16.msra.mxu0 %v2507_v48  ;;  %v3552_v32 = vld [vmem:[#allocation8 + $0x248] sm:$0xf0]  ;;  %v2856_v39 = vld [vmem:[#allocation8 + $0x2f4] sm:$0xf0]  ;;  %v2675_v41 = vor.u32 %v3528_v30, %v2674_v27  ;;  %v3497_v42 = vld [vmem:[#allocation8 + $0x94] sm:$0xf] }
  0x52   : > { %3848 = vset.pattern.permute.xlu0 %v4352_v38  ;;  %v3524_v34 = vld [vmem:[#allocation8 + $0x16c] sm:$0xf]  ;;  %v2556_v43 = vld [vmem:[#allocation8 + $0x9c] sm:$0xf0]  ;;  %v2771_v44 = vor.u32 %v3552_v32, %v2770_v31  ;;  %v3521_v49 = vld [vmem:[#allocation8 + $0x154] sm:$0xf] }
  0x53   : > { %1000 = vmatpush.bf16.msra.mxu1 %v2603_v55  ;;  %1013 = vmatpush.bf16.msra.mxu2 %v2699_v46  ;;  %v3548_v36 = vld [vmem:[#allocation8 + $0x22c] sm:$0xf]  ;;  %v2667_v45 = vor.u32 %v3524_v34, %v2664_v35  ;;  %v2652_v50 = vld [vmem:[#allocation8 + $0x15c] sm:$0xf0]  ;;  %v3545_v51 = vld [vmem:[#allocation8 + $0x214] sm:$0xf]  ;;  %v2559_v52 = vor.u32 %v3497_v42, %v2556_v43 }
  0x54   : > { %1026 = vmatpush.bf16.msra.mxu3 %v2795_v58  ;;  %v3572_v38 = vld [vmem:[#allocation8 + $0x2ec] sm:$0xf]  ;;  %v2763_v47 = vor.u32 %v3548_v36, %v2760_v37  ;;  %v2748_v53 = vld [vmem:[#allocation8 + $0x21c] sm:$0xf0]  ;;  %v3569_v54 = vld [vmem:[#allocation8 + $0x2d4] sm:$0xf]  ;;  %v2655_v46 = vor.u32 %v3521_v49, %v2652_v50 }
  0x55   : > { %988 = vmatpush.bf16.msra.mxu0 %v2495_v59  ;;  %v2859_v48 = vor.u32 %v3572_v38, %v2856_v39  ;;  %v2844_v55 = vld [vmem:[#allocation8 + $0x2dc] sm:$0xf0]  ;;  %v2751_v56 = vor.u32 %v3545_v51, %v2748_v53  ;;  %v3494_v58 = vld [vmem:[#allocation8 + $0x7c] sm:$0xf]  ;;  %v2544_v59 = vld [vmem:[#allocation8 + $0x84] sm:$0xf0] }
  0x56   : > { %v2847_v57 = vor.u32 %v3569_v54, %v2844_v55  ;;  %v3518_v60 = vld [vmem:[#allocation8 + $0x13c] sm:$0xf]  ;;  %v2547_v61 = vor.u32 %v3494_v58, %v2544_v59  ;;  %v2640_v62 = vld [vmem:[#allocation8 + $0x144] sm:$0xf0]  ;;  %v3491_v25 = vld [vmem:[#allocation8 + $0x64] sm:$0xf] }
  0x57   : > { %1001 = vmatpush.bf16.msra.mxu1 %v2591_v23  ;;  %1014 = vmatpush.bf16.msra.mxu2 %v2687_v24  ;;  %v3542_v63 = vld [vmem:[#allocation8 + $0x1fc] sm:$0xf]  ;;  %v2736_v19 = vld [vmem:[#allocation8 + $0x204] sm:$0xf0]  ;;  %v2643_v20 = vor.u32 %v3518_v60, %v2640_v62  ;;  %v2532_v26 = vld [vmem:[#allocation8 + $0x6c] sm:$0xf0] }
  0x58   : > { %1027 = vmatpush.bf16.msra.mxu3 %v2783_v28  ;;  %v2739_v21 = vor.u32 %v3542_v63, %v2736_v19  ;;  %v3566_v22 = vld [vmem:[#allocation8 + $0x2bc] sm:$0xf]  ;;  %v2832_v23 = vld [vmem:[#allocation8 + $0x2c4] sm:$0xf0]  ;;  %v2535_v27 = vor.u32 %v3491_v25, %v2532_v26  ;;  %v3515_v28 = vld [vmem:[#allocation8 + $0x124] sm:$0xf] }
  0x59   : > { %989 = vmatpush.bf16.msra.mxu0 %v2483_v29  ;;  %v2835_v24 = vor.u32 %v3566_v22, %v2832_v23  ;;  %v2628_v29 = vld [vmem:[#allocation8 + $0x12c] sm:$0xf0]  ;;  %v3539_v30 = vld [vmem:[#allocation8 + $0x1e4] sm:$0xf]  ;;  %v3488_v37 = vld [vmem:[#allocation8 + $0x4c] sm:$0xf] }
  0x5a   : > { %v2631_v31 = vor.u32 %v3515_v28, %v2628_v29  ;;  %v2724_v32 = vld [vmem:[#allocation8 + $0x1ec] sm:$0xf0]  ;;  %v2520_v38 = vld [vmem:[#allocation8 + $0x54] sm:$0xf0]  ;;  %v3512_v39 = vld [vmem:[#allocation8 + $0x10c] sm:$0xf] }
  0x5b   : > { %1002 = vmatpush.bf16.msra.mxu1 %v2579_v40  ;;  %1015 = vmatpush.bf16.msra.mxu2 %v2675_v41  ;;  %v2820_v34 = vld [vmem:[#allocation8 + $0x2ac] sm:$0xf0]  ;;  %v2727_v35 = vor.u32 %v3539_v30, %v2724_v32  ;;  %v2523_v40 = vor.u32 %v3488_v37, %v2520_v38  ;;  %v2616_v41 = vld [vmem:[#allocation8 + $0x114] sm:$0xf0]  ;;  %v3536_v42 = vld [vmem:[#allocation8 + $0x1cc] sm:$0xf] }
  0x5c   : > { %1028 = vmatpush.bf16.msra.mxu3 %v2771_v44  ;;  %v2712_v43 = vld [vmem:[#allocation8 + $0x1d4] sm:$0xf0]  ;;  %v2619_v44 = vor.u32 %v3512_v39, %v2616_v41  ;;  %v3485_v50 = vld [vmem:[#allocation8 + $0x34] sm:$0xf]  ;;  %v2508_v51 = vld [vmem:[#allocation8 + $0x3c] sm:$0xf0] }
  0x5d   : > { %1034 = vmatpush.bf16.msrb.mxu0 %v2571_v33  ;;  %v3563_v33 = vld [vmem:[#allocation8 + $0x2a4] sm:$0xf]  ;;  %v3509_v53 = vld [vmem:[#allocation8 + $0xf4] sm:$0xf]  ;;  %v2604_v54 = vld [vmem:[#allocation8 + $0xfc] sm:$0xf0] }
  0x5e   : > { %v2823_v36 = vor.u32 %v3563_v33, %v2820_v34  ;;  %v3533_v55 = vld [vmem:[#allocation8 + $0x1b4] sm:$0xf]  ;;  %v2796_v58 = vld [vmem:[#allocation8 + $0x27c] sm:$0xf0]  ;;  %v2496_v62 = vld [vmem:[#allocation8 + $0x24] sm:$0xf0] }
  0x5f   : > { %1047 = vmatpush.bf16.msrb.mxu1 %v2667_v45  ;;  %1060 = vmatpush.bf16.msrb.mxu2 %v2763_v47  ;;  %v2715_v45 = vor.u32 %v3536_v42, %v2712_v43  ;;  %v3560_v47 = vld [vmem:[#allocation8 + $0x28c] sm:$0xf]  ;;  %v3506_v63 = vld [vmem:[#allocation8 + $0xdc] sm:$0xf]  ;;  %v2688_v22 = vld [vmem:[#allocation8 + $0x1a4] sm:$0xf0] }
  0x60   : > { %1073 = vmatpush.bf16.msrb.mxu3 %v2859_v48  ;;  %v2808_v48 = vld [vmem:[#allocation8 + $0x294] sm:$0xf0]  ;;  %v3554_v25 = vld [vmem:[#allocation8 + $0x25c] sm:$0xf]  ;;  %v2784_v26 = vld [vmem:[#allocation8 + $0x264] sm:$0xf0] }
  0x61   : > { %1035 = vmatpush.bf16.msrb.mxu0 %v2559_v52  ;;  %v2811_v49 = vor.u32 %v3560_v47, %v2808_v48  ;;  %v2511_v52 = vor.u32 %v3485_v50, %v2508_v51  ;;  %v3479_v28 = vld [vmem:[#allocation8 + $0x4] sm:$0xf]  ;;  %v2484_v29 = vld [vmem:[#allocation8 + $0xc] sm:$0xf0]  ;;  %v247_v43 = vperm.slane %v4487_v3, 0  ;;  %v274_v47 = vperm.slane %v4485_v2, 2 }
  0x62   : > { %v3503_v30 = vld [vmem:[#allocation8 + $0xc4] sm:$0xf]  ;;  %v2580_v32 = vld [vmem:[#allocation8 + $0xcc] sm:$0xf0]  ;;  %v275_v48 = vperm.slane %v4487_v3, 2  ;;  %v277_v50 = vperm.slane %v4491_v5, 2 }
  0x63   : > { %1048 = vmatpush.bf16.msrb.mxu1 %v2655_v46  ;;  %1061 = vmatpush.bf16.msrb.mxu2 %v2751_v56  ;;  %v2607_v46 = vor.u32 %v3509_v53, %v2604_v54  ;;  %v2700_v56 = vld [vmem:[#allocation8 + $0x1bc] sm:$0xf0]  ;;  %v3527_v33 = vld [vmem:[#allocation8 + $0x184] sm:$0xf]  ;;  %v2676_v34 = vld [vmem:[#allocation8 + $0x18c] sm:$0xf0] }
  0x64   : > { %1074 = vmatpush.bf16.msrb.mxu3 %v2847_v57  ;;  %v3557_v57 = vld [vmem:[#allocation8 + $0x274] sm:$0xf]  ;;  %v2703_v59 = vor.u32 %v3533_v55, %v2700_v56  ;;  %v3551_v37 = vld [vmem:[#allocation8 + $0x244] sm:$0xf]  ;;  %v2772_v38 = vld [vmem:[#allocation8 + $0x24c] sm:$0xf0] }
  0x65   : > { %1036 = vmatpush.bf16.msrb.mxu0 %v2547_v61  ;;  %v2799_v60 = vor.u32 %v3557_v57, %v2796_v58  ;;  %v3482_v61 = vld [vmem:[#allocation8 + $0x1c] sm:$0xf]  ;;  %v2775_v39 = vor.u32 %v3551_v37, %v2772_v38  ;;  %v258_v51 = vperm.slane %v4485_v2, 1  ;;  %v260_v53 = vperm.slane %v4489_v4, 1  ;;  %s2326_s3 = scalar_lea.vmem [#allocation19], %s2471_s7  ;;  %s217_s2 = sadd.s32 1, %s4329_s2  }
  0x66   : > { %v2499_v19 = vor.u32 %v3482_v61, %v2496_v62  ;;  %v261_v54 = vperm.slane %v4491_v5, 1  ;;  %v290_v55 = vperm.slane %v4485_v2, 3  ;;  %v292_v56 = vperm.slane %v4489_v4, 3  ;;  %p4774_p0 = scmp.ge.s32.totalorder %s217_s2, 4  }
  0x67   : > { %1049 = vmatpush.bf16.msrb.mxu1 %v2643_v20  ;;  %1062 = vmatpush.bf16.msrb.mxu2 %v2739_v21  ;;  %v2592_v20 = vld [vmem:[#allocation8 + $0xe4] sm:$0xf0]  ;;  %v3530_v21 = vld [vmem:[#allocation8 + $0x19c] sm:$0xf]  ;;  %v293_v57 = vperm.slane %v4491_v5, 3  ;;  %vm303_vm1 = vcmp.gt.f32.partialorder %v4321_v8, 1.0 }
  0x68   : > { %1075 = vmatpush.bf16.msrb.mxu3 %v2835_v24  ;;  %v2595_v23 = vor.u32 %v3506_v63, %v2592_v20  ;;  %v2691_v24 = vor.u32 %v3530_v21, %v2688_v22  ;;  %v314_v58 = vmul.f32 0.95, %v4325_v7  ;;  %vm304_vm2 = vcmp.gt.f32.partialorder %v4317_v9, 1.0  ;;  %s2360_s30 = sshll.u32 (%p4774_p0), %s4859_s13, 4  ;;  %s4355_s0 = smov (%p4774_p0), [#allocation20]   ;;  %s2361_s30 = int_to_ptr.hbm [resolvable:$true] %s2360_s30 }
  0x69   : > { %1037 = vmatpush.bf16.msrb.mxu0 %v2535_v27  ;;  %v2787_v27 = vor.u32 %v3554_v25, %v2784_v26  ;;  %v316_v37 = vmul.f32 0.95, %v4317_v9  ;;  %vm305_vm3 = vcmp.gt.f32.partialorder %v4313_v10, 1.0  ;;  %v317_v38 = vmul.f32 0.95, %v4313_v10  ;;  %s2358_s6 = sshll.u32 (%p4774_p0), %s4355_s0, 4  ;;  %s2359_s6 = int_to_ptr.vmem [resolvable:$true] %s2358_s6 }
  0x6a   : > { %vm1138_vm12 = vcmp.gt.f32.partialorder %v4309_v11, 1.0  ;;  %vm1139_vm15 = vcmp.gt.f32.partialorder %v4305_v12, 1.0  ;;  %s4356_s17 = smov (%p4774_p0), [#allocation23]   ;;  %s2382_s9 = sshll.u32 (%p4774_p0), %s4861_s15, 4  ;;  %s2383_s9 = int_to_ptr.hbm [resolvable:$true] %s2382_s9 }
  0x6b   : > { %1050 = vmatpush.bf16.msrb.mxu1 %v2631_v31  ;;  %1063 = vmatpush.bf16.msrb.mxu2 %v2727_v35  ;;  %v2487_v31 = vor.u32 %v3479_v28, %v2484_v29  ;;  %v2583_v35 = vor.u32 %v3503_v30, %v2580_v32  ;;  %s2380_s18 = sshll.u32 (%p4774_p0), %s4356_s17, 4  ;;  %s2346_s21 = sshll.u32 (%p4774_p0), %s4858_s12, 4  ;;  %s2381_s18 = int_to_ptr.vmem [resolvable:$true] %s2380_s18  ;;  %s2347_s21 = int_to_ptr.hbm [resolvable:$true] %s2346_s21 }
  0x6c   : > { %1076 = vmatpush.bf16.msrb.mxu3 %v2823_v36  ;;  %v2679_v36 = vor.u32 %v3527_v33, %v2676_v34  ;;  %s4357_s24 = smov (%p4774_p0), [#allocation19]   ;;  %s4358_s8 = smov (%p4774_p0), [#allocation22]  }
  0x6d   : > { %1038 = vmatpush.bf16.msrb.mxu0 %v2523_v40  ;;  %v246_v40 = vperm.slane %v4485_v2, 0  ;;  %s2344_s15 = sshll.u32 (%p4774_p0), %s4357_s24, 4  ;;  %s2369_s12 = sshll.u32 (%p4774_p0), %s4358_s8, 4  ;;  %s2345_s15 = int_to_ptr.vmem [resolvable:$true] %s2344_s15  ;;  %s2370_s12 = int_to_ptr.vmem [resolvable:$true] %s2369_s12 }
  0x6e   :  { %s2371_s11 = sshll.u32 (%p4774_p0), %s4860_s14, 4  ;;  %s2393_s2 = sshll.u32 (%p4774_p0), %s4862_s16, 4  ;;  %s2372_s11 = int_to_ptr.hbm [resolvable:$true] %s2371_s11  ;;  %s2394_s2 = int_to_ptr.hbm [resolvable:$true] %s2393_s2 }
  0x6f   : > { %1051 = vmatpush.bf16.msrb.mxu1 %v2619_v44  ;;  %1064 = vmatpush.bf16.msrb.mxu2 %v2715_v45  ;;  %v248_v44 = vperm.slane %v4489_v4, 0  ;;  %v249_v45 = vperm.slane %v4491_v5, 0  ;;  %s4359_s7 = smov (%p4774_p0), [#allocation25]  }
  0x70   : > { %1077 = vmatpush.bf16.msrb.mxu3 %v2811_v49  ;;  %v276_v49 = vperm.slane %v4489_v4, 2  ;;  %s2391_s26 = sshll.u32 (%p4774_p0), %s4359_s7, 4  ;;  %s2392_s26 = int_to_ptr.vmem [resolvable:$true] %s2391_s26 }
  0x71   : > { %1039 = vmatpush.bf16.msrb.mxu0 %v2511_v52  ;;  %v259_v52 = vperm.slane %v4487_v3, 1 }
  0x73   : > { %1052 = vmatpush.bf16.msrb.mxu1 %v2607_v46  ;;  %1065 = vmatpush.bf16.msrb.mxu2 %v2703_v59  ;;  %v291_v46 = vperm.slane %v4487_v3, 3  ;;  %v315_v59 = vmul.f32 0.95, %v4321_v8 }
  0x74   : > { %1078 = vmatpush.bf16.msrb.mxu3 %v2799_v60 }
  0x75   : > { %1040 = vmatpush.bf16.msrb.mxu0 %v2499_v19 }
  0x77   : > { %1053 = vmatpush.bf16.msrb.mxu1 %v2595_v23  ;;  %1066 = vmatpush.bf16.msrb.mxu2 %v2691_v24 }
  0x78   : > { %1079 = vmatpush.bf16.msrb.mxu3 %v2787_v27 }
  0x79   : > { %1041 = vmatpush.bf16.msrb.mxu0 %v2487_v31 }
  0x7b   : > { %1054 = vmatpush.bf16.msrb.mxu1 %v2583_v35  ;;  %1067 = vmatpush.bf16.msrb.mxu2 %v2679_v36 }
  0x7c   : > { %1080 = vmatpush.bf16.msrb.mxu3 %v2775_v39 }
  0xb2   : > { %v244_v41 = vpop.permute.xlu0 %243 }
  0xb3   : > { %v272_v42 = vpop.permute.xlu1 %271  ;;  %v250_v60 = vmul.f32 %v246_v40, %v244_v41  ;;  %v251_v61 = vmul.f32 %v247_v43, %v244_v41  ;;  %v252_v62 = vmul.f32 %v248_v44, %v244_v41  ;;  %v253_v63 = vmul.f32 %v249_v45, %v244_v41 }
  0xb4   : > { %v278_v19 = vmul.f32 %v274_v47, %v272_v42  ;;  %v279_v20 = vmul.f32 %v275_v48, %v272_v42  ;;  %v280_v21 = vmul.f32 %v276_v49, %v272_v42  ;;  %v281_v22 = vmul.f32 %v277_v50, %v272_v42 }
  0xb5   : > { %v4353_v48 = vmov 0.0  }
  0xb6   : > { %v2472_v49 = vsel %vm302_vm0, 1.0, %v4353_v48  ;;  %v2473_v9 = vsel %vm303_vm1, 1.0, %v4353_v48  ;;  %v2474_v50 = vsel %vm304_vm2, 1.0, %v4353_v48  ;;  %v2475_v10 = vsel %vm305_vm3, 1.0, %v4353_v48 }
  0xb7   : > { %vm1140_vm2 = vcmp.gt.f32.partialorder %v4301_v13, 1.0 }
  0xbc   : > { %v256_v23 = vpop.permute.xlu0 %255  ;;  %v288_v24 = vpop.permute.xlu1 %287 }
  0xbd   : > { %v262_v25 = vmul.f32 %v258_v51, %v256_v23  ;;  %v263_v26 = vmul.f32 %v259_v52, %v256_v23  ;;  %v264_v27 = vmul.f32 %v260_v53, %v256_v23  ;;  %v265_v28 = vmul.f32 %v261_v54, %v256_v23 }
  0xbe   : > { %v294_v29 = vmul.f32 %v290_v55, %v288_v24  ;;  %v295_v30 = vmul.f32 %v291_v46, %v288_v24  ;;  %v296_v31 = vmul.f32 %v292_v56, %v288_v24  ;;  %v297_v32 = vmul.f32 %v293_v57, %v288_v24  ;;  %v2574_v55 = vld [vmem:[#allocation8 + $0xb0] sm:$0xf]  ;;  %v3502_v46 = vld [vmem:[#allocation8 + $0xb8] sm:$0xf0] }
  0xbf   : > { %v266_v33 = vadd.f32 %v262_v25, %v250_v60  ;;  %v267_v34 = vadd.f32 %v263_v26, %v251_v61  ;;  %v268_v35 = vadd.f32 %v264_v27, %v252_v62  ;;  %v269_v36 = vadd.f32 %v265_v28, %v253_v63  ;;  %v2670_v56 = vld [vmem:[#allocation8 + $0x170] sm:$0xf]  ;;  %v3526_v57 = vld [vmem:[#allocation8 + $0x178] sm:$0xf0]  ;;  %v2658_v25 = vld [vmem:[#allocation8 + $0x158] sm:$0xf] }
  0xc0   : > { %v2671_v23 = vor.u32 %v3526_v57, %v2670_v56  ;;  %v3523_v26 = vld [vmem:[#allocation8 + $0x160] sm:$0xf0]  ;;  %v4354_v27 = vmov 1.0|1.0   ;;  %v3541_v56 = vld [vmem:[#allocation8 + $0x1f0] sm:$0xf0] }
  0xc1   : > { %v282_v39 = vadd.f32 %v278_v19, %v266_v33  ;;  %v283_v40 = vadd.f32 %v279_v20, %v267_v34  ;;  %v284_v41 = vadd.f32 %v280_v21, %v268_v35  ;;  %v285_v42 = vadd.f32 %v281_v22, %v269_v36  ;;  %v2766_v19 = vld [vmem:[#allocation8 + $0x230] sm:$0xf]  ;;  %v3550_v20 = vld [vmem:[#allocation8 + $0x238] sm:$0xf0]  ;;  %v2850_v34 = vld [vmem:[#allocation8 + $0x2d8] sm:$0xf] }
  0xc2   : > { %v2575_v21 = vor.u32 %v3502_v46, %v2574_v55  ;;  %v2862_v22 = vld [vmem:[#allocation8 + $0x2f0] sm:$0xf]  ;;  %v2767_v24 = vor.u32 %v3550_v20, %v2766_v19  ;;  %v3571_v35 = vld [vmem:[#allocation8 + $0x2e0] sm:$0xf0]  ;;  %v2730_v46 = vld [vmem:[#allocation8 + $0x1e8] sm:$0xf] }
  0xc3   : > { %v298_v43 = vadd.f32 %v294_v29, %v282_v39  ;;  %v299_v44 = vadd.f32 %v295_v30, %v283_v40  ;;  %v300_v45 = vadd.f32 %v296_v31, %v284_v41  ;;  %v301_v47 = vadd.f32 %v297_v32, %v285_v42  ;;  %v2754_v30 = vld [vmem:[#allocation8 + $0x218] sm:$0xf]  ;;  %v3547_v31 = vld [vmem:[#allocation8 + $0x220] sm:$0xf0]  ;;  %v3496_v39 = vld [vmem:[#allocation8 + $0x88] sm:$0xf0] }
  0xc4   : > { %v2755_v40 = vor.u32 %v3547_v31, %v2754_v30  ;;  %v2646_v41 = vld [vmem:[#allocation8 + $0x140] sm:$0xf]  ;;  %v3520_v42 = vld [vmem:[#allocation8 + $0x148] sm:$0xf0]  ;;  %v2826_v19 = vld [vmem:[#allocation8 + $0x2a8] sm:$0xf] }
  0xc5   : > { %v318_v51 = vadd.f32 %v314_v58, %v298_v43  ;;  %v319_v52 = vadd.f32 %v315_v59, %v299_v44  ;;  %v320_v53 = vadd.f32 %v316_v37, %v300_v45  ;;  %v321_v54 = vadd.f32 %v317_v38, %v301_v47  ;;  %v3574_v58 = vld [vmem:[#allocation8 + $0x2f8] sm:$0xf0]  ;;  %v2562_v59 = vld [vmem:[#allocation8 + $0x98] sm:$0xf]  ;;  %v2550_v38 = vld [vmem:[#allocation8 + $0x80] sm:$0xf] }
  0xc6   : > { %v2863_v29 = vor.u32 %v3574_v58, %v2862_v22  ;;  %v2659_v37 = vor.u32 %v3523_v26, %v2658_v25  ;;  %v2851_v43 = vor.u32 %v3571_v35, %v2850_v34  ;;  %v2742_v44 = vld [vmem:[#allocation8 + $0x200] sm:$0xf]  ;;  %v3544_v45 = vld [vmem:[#allocation8 + $0x208] sm:$0xf0]  ;;  %v2551_v47 = vor.u32 %v3496_v39, %v2550_v38  ;;  %v3565_v20 = vld [vmem:[#allocation8 + $0x2b0] sm:$0xf0] }
  0xc7   : > { %v4600_v7 = vsub.f32 %v318_v51, %v2472_v49   ;;  %v4602_v8 = vsub.f32 %v319_v52, %v2473_v9   ;;  %v4604_v9 = vsub.f32 %v320_v53, %v2474_v50   ;;  %v4606_v10 = vsub.f32 %v321_v54, %v2475_v10   ;;  %v2838_v49 = vld [vmem:[#allocation8 + $0x2c0] sm:$0xf]  ;;  %v3493_v51 = vld [vmem:[#allocation8 + $0x70] sm:$0xf0]  ;;  %v2634_v53 = vld [vmem:[#allocation8 + $0x128] sm:$0xf] }
  0xc8   : > { %v2647_v50 = vor.u32 %v3520_v42, %v2646_v41  ;;  %v2743_v52 = vor.u32 %v3544_v45, %v2742_v44  ;;  %v3517_v54 = vld [vmem:[#allocation8 + $0x130] sm:$0xf0]  ;;  %v2526_v22 = vld [vmem:[#allocation8 + $0x50] sm:$0xf]  ;;  %v3490_v58 = vld [vmem:[#allocation8 + $0x58] sm:$0xf0] }
  0xc9   : > { %v4865_v60 = vmov %v4600_v7  ;;  %v4866_v61 = vmov %v4602_v8  ;;  %v4867_v62 = vmov %v4604_v9  ;;  %v4868_v63 = vmov %v4606_v10  ;;  %v3499_v7 = vld [vmem:[#allocation8 + $0xa0] sm:$0xf0]  ;;  %v3568_v9 = vld [vmem:[#allocation8 + $0x2c8] sm:$0xf0]  ;;  %v2538_v10 = vld [vmem:[#allocation8 + $0x68] sm:$0xf] }
  0xca   : > { %vm326_vm4 = vcmp.gt.f32.partialorder %v4865_v60, 1.0  ;;  %vm327_vm5 = vcmp.gt.f32.partialorder %v4866_v61, 1.0  ;;  %vm328_vm6 = vcmp.gt.f32.partialorder %v4867_v62, 1.0  ;;  %vm329_vm8 = vcmp.gt.f32.partialorder %v4868_v63, 1.0  ;;  %v2718_v25 = vld [vmem:[#allocation8 + $0x1d0] sm:$0xf] }
  0xcb   : > { %vm4611_vm7 = vmpackc.low %vm326_vm4, %vm326_vm4  ;;  %v2563_v33 = vor.u32 %v3499_v7, %v2562_v59  ;;  %v2839_v55 = vor.u32 %v3568_v9, %v2838_v49  ;;  %v2539_v57 = vor.u32 %v3493_v51, %v2538_v10  ;;  %v2731_v59 = vor.u32 %v3541_v56, %v2730_v46  ;;  %v3514_v7 = vld [vmem:[#allocation8 + $0x118] sm:$0xf0]  ;;  %v2814_v30 = vld [vmem:[#allocation8 + $0x290] sm:$0xf]  ;;  %2328 = vst [vmem:[#allocation20] sm:$0xff] (%p4774_p0), %v4865_v60 }
  0xcc   : > { %2865 = vmatmul.msk.bf16.vlgmr.msra.gmra.mxu0 %vm4611_vm7, %v4354_v27  ;;  %vm4619_vm9 = vmpackc.low %vm327_vm5, %vm327_vm5  ;;  %v3538_v26 = vld [vmem:[#allocation8 + $0x1d8] sm:$0xf0]  ;;  %v2514_v34 = vld [vmem:[#allocation8 + $0x38] sm:$0xf]  ;;  %vm2132_vm5 = vcmp.gt.f32.partialorder %v4293_v15, 1.0  ;;  %2329 = vst [vmem:[#allocation20 + $0x8] sm:$0xff] (%p4774_p0), %v4866_v61 }
  0xcd   : > { %2867 = vmatmul.msk.bf16.vlgmr.msra.gmra.mxu1 %vm4619_vm9, %v4354_v27  ;;  %vm4626_vm10 = vmpackc.low %vm328_vm6, %vm328_vm6  ;;  %1086 = vmatpush.bf16.msra.mxu0 %v2575_v21  ;;  %v2635_v21 = vor.u32 %v3517_v54, %v2634_v53  ;;  %v3562_v31 = vld [vmem:[#allocation8 + $0x298] sm:$0xf0]  ;;  %v3487_v35 = vld [vmem:[#allocation8 + $0x40] sm:$0xf0]  ;;  %vm2131_vm6 = vcmp.gt.f32.partialorder %v4297_v14, 1.0  ;;  %2330 = vst [vmem:[#allocation20 + $0x10] sm:$0xff] (%p4774_p0), %v4867_v62 }
  0xce   : > { %2869 = vmatmul.msk.bf16.vlgmr.msra.gmra.mxu2 %vm4626_vm10, %v4354_v27  ;;  %vm4636_vm11 = vmpackc.low %vm329_vm8, %vm329_vm8  ;;  %1099 = vmatpush.bf16.msra.mxu1 %v2671_v23  ;;  %v2622_v23 = vld [vmem:[#allocation8 + $0x110] sm:$0xf]  ;;  %v2610_v38 = vld [vmem:[#allocation8 + $0xf8] sm:$0xf]  ;;  %vm2149_vm8 = vcmp.gt.f32.partialorder %v4285_v17, 1.0  ;;  %2331 = vst [vmem:[#allocation20 + $0x18] sm:$0xff] (%p4774_p0), %v4868_v63 }
  0xcf   : > { %2871 = vmatmul.msk.bf16.vlgmr.msra.gmra.mxu3 %vm4636_vm11, %v4354_v27  ;;  %1112 = vmatpush.bf16.msra.mxu2 %v2767_v24  ;;  %v2827_v24 = vor.u32 %v3565_v20, %v2826_v19  ;;  %v3511_v39 = vld [vmem:[#allocation8 + $0x100] sm:$0xf0]  ;;  %v2706_v41 = vld [vmem:[#allocation8 + $0x1b8] sm:$0xf]  ;;  %v2502_v49 = vld [vmem:[#allocation8 + $0x20] sm:$0xf] }
  0xd0   : > { %1125 = vmatpush.bf16.msra.mxu3 %v2863_v29  ;;  %v2527_v29 = vor.u32 %v3490_v58, %v2526_v22  ;;  %v3535_v42 = vld [vmem:[#allocation8 + $0x1c0] sm:$0xf0]  ;;  %v2802_v44 = vld [vmem:[#allocation8 + $0x278] sm:$0xf]  ;;  %v3484_v9 = vld [vmem:[#allocation8 + $0x28] sm:$0xf0] }
  0xd1   : > { %1087 = vmatpush.bf16.msra.mxu0 %v2563_v33  ;;  %v2623_v33 = vor.u32 %v3514_v7, %v2622_v23  ;;  %v3559_v45 = vld [vmem:[#allocation8 + $0x280] sm:$0xf0]  ;;  %v2598_v10 = vld [vmem:[#allocation8 + $0xe0] sm:$0xf]  ;;  %v3508_v51 = vld [vmem:[#allocation8 + $0xe8] sm:$0xf0] }
  0xd2   : > { %1100 = vmatpush.bf16.msra.mxu1 %v2659_v37  ;;  %v2719_v37 = vor.u32 %v3538_v26, %v2718_v25  ;;  %v2694_v53 = vld [vmem:[#allocation8 + $0x1a0] sm:$0xf]  ;;  %v3532_v54 = vld [vmem:[#allocation8 + $0x1a8] sm:$0xf0]  ;;  %v2599_v19 = vor.u32 %v3508_v51, %v2598_v10  ;;  %v3481_v20 = vld [vmem:[#allocation8 + $0x10] sm:$0xf0] }
  0xd3   : > { %1113 = vmatpush.bf16.msra.mxu2 %v2755_v40  ;;  %v2815_v40 = vor.u32 %v3562_v31, %v2814_v30  ;;  %v2790_v46 = vld [vmem:[#allocation8 + $0x260] sm:$0xf]  ;;  %v3556_v56 = vld [vmem:[#allocation8 + $0x268] sm:$0xf0]  ;;  %v3505_v22 = vld [vmem:[#allocation8 + $0xd0] sm:$0xf0]  ;;  %v2695_v58 = vor.u32 %v3532_v54, %v2694_v53 }
  0xd4   : > { %1126 = vmatpush.bf16.msra.mxu3 %v2851_v43  ;;  %v2515_v43 = vor.u32 %v3487_v35, %v2514_v34  ;;  %v3036_v23 = vld [vmem:[#allocation10 + $0x118] sm:$0xf]  ;;  %v3612_v7 = vld [vmem:[#allocation10 + $0x128] sm:$0xf0]  ;;  %v3529_v25 = vld [vmem:[#allocation8 + $0x190] sm:$0xf0] }
  0xd5   : > { %1088 = vmatpush.bf16.msra.mxu0 %v2551_v47  ;;  %v2611_v47 = vor.u32 %v3511_v39, %v2610_v38  ;;  %v3196_v26 = vld [vmem:[#allocation10 + $0x258] sm:$0xf]  ;;  %v2778_v31 = vld [vmem:[#allocation8 + $0x248] sm:$0xf]  ;;  %v3037_v35 = vor.u32 %v3612_v7, %v3036_v23  ;;  %v3038_v38 = vld [vmem:[#allocation10 + $0x12c] sm:$0xf0] }
  0xd6   : > { %1101 = vmatpush.bf16.msra.mxu1 %v2647_v50  ;;  %v2707_v50 = vor.u32 %v3535_v42, %v2706_v41  ;;  %v3607_v41 = vld [vmem:[#allocation10 + $0x100] sm:$0xf0]  ;;  %v2996_v10 = vld [vmem:[#allocation10 + $0xc8] sm:$0xf]  ;;  %v3602_v51 = vld [vmem:[#allocation10 + $0xd8] sm:$0xf0] }
  0xd7   : > { %1114 = vmatpush.bf16.msra.mxu2 %v2743_v52  ;;  %v2803_v52 = vor.u32 %v3559_v45, %v2802_v44  ;;  %v3176_v44 = vld [vmem:[#allocation10 + $0x230] sm:$0xf]  ;;  %v3647_v45 = vld [vmem:[#allocation10 + $0x240] sm:$0xf0]  ;;  %v3356_v53 = vld [vmem:[#allocation10 + $0x398] sm:$0xf] }
  0xd8   : > { %1127 = vmatpush.bf16.msra.mxu3 %v2839_v55  ;;  %v2503_v55 = vor.u32 %v3484_v9, %v2502_v49  ;;  %v3605_v9 = vld [vmem:[#allocation10 + $0xf4] sm:$0xf]  ;;  %v3692_v54 = vld [vmem:[#allocation10 + $0x3a8] sm:$0xf0]  ;;  %v2976_v8 = vld [vmem:[#allocation10 + $0xa0] sm:$0xf] }
  0xd9   : > { %1089 = vmatpush.bf16.msra.mxu0 %v2539_v57  ;;  %v2490_v57 = vld [vmem:[#allocation8 + $0x8] sm:$0xf]  ;;  %v3136_v23 = vld [vmem:[#allocation10 + $0x1e0] sm:$0xf]  ;;  %v3637_v7 = vld [vmem:[#allocation10 + $0x1f0] sm:$0xf0] }
  0xda   : > { %1102 = vmatpush.bf16.msra.mxu1 %v2635_v21  ;;  %v2586_v21 = vld [vmem:[#allocation8 + $0xc8] sm:$0xf]  ;;  %v2491_v30 = vor.u32 %v3481_v20, %v2490_v57  ;;  %v3600_v20 = vld [vmem:[#allocation10 + $0xcc] sm:$0xf]  ;;  %v3137_v36 = vor.u32 %v3637_v7, %v3136_v23  ;;  %v3575_v7 = vld [vmem:[#allocation10 + $0x4] sm:$0xf] }
  0xdb   : > { %1115 = vmatpush.bf16.msra.mxu2 %v2731_v59  ;;  %v2682_v59 = vld [vmem:[#allocation8 + $0x188] sm:$0xf]  ;;  %v2587_v34 = vor.u32 %v3505_v22, %v2586_v21  ;;  %v2998_v21 = vld [vmem:[#allocation10 + $0xdc] sm:$0xf0]  ;;  %v3336_v22 = vld [vmem:[#allocation10 + $0x370] sm:$0xf] }
  0xdc   : > { %1128 = vmatpush.bf16.msra.mxu3 %v2827_v24  ;;  %2873 = vmatmul.msk.bf16.vlgmr.msrb.gmra.mxu0 %vm4611_vm7, %v4354_v27  ;;  %v2791_v24 = vor.u32 %v3556_v56, %v2790_v46  ;;  %v2683_v39 = vor.u32 %v3529_v25, %v2682_v59  ;;  %v3642_v46 = vld [vmem:[#allocation10 + $0x218] sm:$0xf0]  ;;  %v3357_v56 = vor.u32 %v3692_v54, %v3356_v53  ;;  %v3687_v59 = vld [vmem:[#allocation10 + $0x380] sm:$0xf0]  ;;  %2363 = dma.vmem_to_hbm [thread:$0]  (%p4774_p0), %s2359_s6, 512, %s2361_s30, [#allocation21]  }
  0xdd   : > { %2875 = vmatmul.msk.bf16.vlgmr.msrb.gmra.mxu1 %vm4619_vm9, %v4354_v27  ;;  %1090 = vmatpush.bf16.msra.mxu0 %v2527_v29  ;;  %v3652_v29 = vld [vmem:[#allocation10 + $0x268] sm:$0xf0]  ;;  %v3001_v32 = vor.u32 %v3600_v20, %v2998_v21  ;;  %v3582_v53 = vld [vmem:[#allocation10 + $0x38] sm:$0xf0]  ;;  %v2918_v20 = vld [vmem:[#allocation10 + $0x3c] sm:$0xf0] }
  0xde   : > { %2877 = vmatmul.msk.bf16.vlgmr.msrb.gmra.mxu2 %vm4626_vm10, %v4354_v27  ;;  %1103 = vmatpush.bf16.msra.mxu1 %v2623_v33  ;;  %v3553_v33 = vld [vmem:[#allocation8 + $0x250] sm:$0xf0]  ;;  %v3197_v42 = vor.u32 %v3652_v29, %v3196_v26  ;;  %v3595_v26 = vld [vmem:[#allocation10 + $0xa4] sm:$0xf]  ;;  %v2978_v29 = vld [vmem:[#allocation10 + $0xb4] sm:$0xf0] }
  0xdf   : > { %2879 = vmatmul.msk.bf16.vlgmr.msrb.gmra.mxu3 %vm4636_vm11, %v4354_v27  ;;  %1116 = vmatpush.bf16.msra.mxu2 %v2719_v37  ;;  %v3610_v37 = vld [vmem:[#allocation10 + $0x11c] sm:$0xf]  ;;  %v2896_v21 = vld [vmem:[#allocation10] sm:$0xf] }
  0xe0   : > { %1129 = vmatpush.bf16.msra.mxu3 %v2815_v40  ;;  %v3016_v40 = vld [vmem:[#allocation10 + $0xf0] sm:$0xf] }
  0xe1   : > { %1091 = vmatpush.bf16.msra.mxu0 %v2515_v43  ;;  %v2779_v43 = vor.u32 %v3553_v33, %v2778_v31  ;;  %v3017_v49 = vor.u32 %v3607_v41, %v3016_v40  ;;  %v2956_v31 = vld [vmem:[#allocation10 + $0x78] sm:$0xf]  ;;  %v3592_v33 = vld [vmem:[#allocation10 + $0x88] sm:$0xf0]  ;;  %v3590_v41 = vld [vmem:[#allocation10 + $0x7c] sm:$0xf] }
  0xe2   : > { %1104 = vmatpush.bf16.msra.mxu1 %v2611_v47  ;;  %v3041_v47 = vor.u32 %v3610_v37, %v3038_v38  ;;  %v3632_v37 = vld [vmem:[#allocation10 + $0x1c8] sm:$0xf0]  ;;  %v2957_v40 = vor.u32 %v3592_v33, %v2956_v31 }
  0xe3   : > { %1117 = vmatpush.bf16.msra.mxu2 %v2707_v50  ;;  %v3018_v50 = vld [vmem:[#allocation10 + $0x104] sm:$0xf0] }
  0xe4   : > { %1130 = vmatpush.bf16.msra.mxu3 %v2803_v52  ;;  %v3177_v52 = vor.u32 %v3647_v45, %v3176_v44  ;;  %v3021_v57 = vor.u32 %v3605_v9, %v3018_v50  ;;  %v3587_v44 = vld [vmem:[#allocation10 + $0x60] sm:$0xf0] }
  0xe5   : > { %1092 = vmatpush.bf16.msra.mxu0 %v2503_v55  ;;  %v3156_v55 = vld [vmem:[#allocation10 + $0x208] sm:$0xf] }
  0xe6   : > { %1105 = vmatpush.bf16.msra.mxu1 %v2599_v19  ;;  %v2997_v19 = vor.u32 %v3602_v51, %v2996_v10  ;;  %v3157_v28 = vor.u32 %v3642_v46, %v3156_v55  ;;  %v3585_v10 = vld [vmem:[#allocation10 + $0x54] sm:$0xf]  ;;  %v2938_v51 = vld [vmem:[#allocation10 + $0x64] sm:$0xf0]  ;;  %v3622_v46 = vld [vmem:[#allocation10 + $0x178] sm:$0xf0] }
  0xe7   : > { %1118 = vmatpush.bf16.msra.mxu2 %v2695_v58  ;;  %v3597_v58 = vld [vmem:[#allocation10 + $0xb0] sm:$0xf0]  ;;  %v3076_v55 = vld [vmem:[#allocation10 + $0x168] sm:$0xf] }
  0xe8   : > { %1131 = vmatpush.bf16.msra.mxu3 %v2791_v24  ;;  %v3337_v24 = vor.u32 %v3687_v59, %v3336_v22  ;;  %v2977_v25 = vor.u32 %v3597_v58, %v2976_v8  ;;  %v3577_v22 = vld [vmem:[#allocation10 + $0x10] sm:$0xf0]  ;;  %v3077_v8 = vor.u32 %v3622_v46, %v3076_v55  ;;  %v3650_v58 = vld [vmem:[#allocation10 + $0x25c] sm:$0xf]  ;;  %v3118_v46 = vld [vmem:[#allocation10 + $0x1cc] sm:$0xf0] }
  0xe9   : > { %1093 = vmatpush.bf16.msra.mxu0 %v2491_v30  ;;  %v3316_v30 = vld [vmem:[#allocation10 + $0x348] sm:$0xf]  ;;  %v2897_v23 = vor.u32 %v3577_v22, %v2896_v21  ;;  %v3630_v55 = vld [vmem:[#allocation10 + $0x1bc] sm:$0xf]  ;;  %v3124_v21 = vld [vmem:[#allocation10 + $0x1c0] sm:$0xf] }
  0xea   : > { %1106 = vmatpush.bf16.msra.mxu1 %v2587_v34  ;;  %v3682_v34 = vld [vmem:[#allocation10 + $0x358] sm:$0xf0] }
  0xeb   : > { %1119 = vmatpush.bf16.msra.mxu2 %v2683_v39  ;;  %v3317_v38 = vor.u32 %v3682_v34, %v3316_v30  ;;  %v2981_v39 = vor.u32 %v3595_v26, %v2978_v29  ;;  %v3653_v26 = vld [vmem:[#allocation10 + $0x270] sm:$0xf0]  ;;  %v3178_v30 = vld [vmem:[#allocation10 + $0x244] sm:$0xf0]  ;;  %v3184_v34 = vld [vmem:[#allocation10 + $0x238] sm:$0xf] }
  0xec   : > { %1132 = vmatpush.bf16.msra.mxu3 %v2779_v43  ;;  %2881 = vmatmul.msk.bf16.vlgmr.msra.gmra.mxu0 %vm4611_vm7, %v4354_v27  ;;  %v2936_v43 = vld [vmem:[#allocation10 + $0x50] sm:$0xf]  ;;  %v3645_v29 = vld [vmem:[#allocation10 + $0x234] sm:$0xf]  ;;  %vm2133_vm7 = vcmp.gt.f32.partialorder %v4289_v16, 1.0 }
  0xed   : > { %1936 = vmatpush.bf16.msrb.mxu0 %v3037_v35  ;;  %2883 = vmatmul.msk.bf16.vlgmr.msra.gmra.mxu1 %vm4619_vm9, %v4354_v27  ;;  %v3116_v35 = vld [vmem:[#allocation10 + $0x1b8] sm:$0xf]  ;;  %v2937_v50 = vor.u32 %v3587_v44, %v2936_v43  ;;  %v3635_v44 = vld [vmem:[#allocation10 + $0x1e4] sm:$0xf] }
  0xee   : > { %1949 = vmatpush.bf16.msrb.mxu1 %v3197_v42  ;;  %2885 = vmatmul.msk.bf16.vlgmr.msra.gmra.mxu2 %vm4626_vm10, %v4354_v27  ;;  %v2958_v42 = vld [vmem:[#allocation10 + $0x8c] sm:$0xf0]  ;;  %v3117_v45 = vor.u32 %v3632_v37, %v3116_v35  ;;  %v3648_v35 = vld [vmem:[#allocation10 + $0x248] sm:$0xf0] }
  0xef   : > { %2887 = vmatmul.msk.bf16.vlgmr.msra.gmra.mxu3 %vm4636_vm11, %v4354_v27  ;;  %1962 = vmatpush.bf16.msrb.mxu2 %v3357_v56  ;;  %v2961_v9 = vor.u32 %v3590_v41, %v2958_v42  ;;  %v2941_v56 = vor.u32 %v3585_v10, %v2938_v51  ;;  %v3640_v37 = vld [vmem:[#allocation10 + $0x20c] sm:$0xf]  ;;  %v3164_v41 = vld [vmem:[#allocation10 + $0x210] sm:$0xf]  ;;  %v3643_v42 = vld [vmem:[#allocation10 + $0x220] sm:$0xf0] }
  0xf0   : > { %1975 = vmatpush.bf16.msrb.mxu3 %v3041_v47  ;;  %v3096_v47 = vld [vmem:[#allocation10 + $0x190] sm:$0xf]  ;;  %v3165_v43 = vor.u32 %v3643_v42, %v3164_v41  ;;  %v3056_v10 = vld [vmem:[#allocation10 + $0x140] sm:$0xf]  ;;  %v3617_v51 = vld [vmem:[#allocation10 + $0x150] sm:$0xf0] }
  0xf1   : > { %1937 = vmatpush.bf16.msrb.mxu0 %v3017_v49  ;;  %v3627_v49 = vld [vmem:[#allocation10 + $0x1a0] sm:$0xf0]  ;;  %vm2150_vm11 = vcmp.gt.f32.partialorder %v4281_v18, 1.0 }
  0xf2   : > { %1950 = vmatpush.bf16.msrb.mxu1 %v3177_v52  ;;  %v2916_v52 = vld [vmem:[#allocation10 + $0x28] sm:$0xf]  ;;  %v3097_v54 = vor.u32 %v3627_v49, %v3096_v47 }
  0xf3   : > { %1963 = vmatpush.bf16.msrb.mxu2 %v3337_v24  ;;  %v2898_v24 = vld [vmem:[#allocation10 + $0x14] sm:$0xf0]  ;;  %v3144_v49 = vld [vmem:[#allocation10 + $0x1e8] sm:$0xf] }
  0xf4   : > { %1976 = vmatpush.bf16.msrb.mxu3 %v3021_v57  ;;  %v2917_v57 = vor.u32 %v3582_v53, %v2916_v52  ;;  %v2901_v31 = vor.u32 %v3575_v7, %v2898_v24  ;;  %v3296_v52 = vld [vmem:[#allocation10 + $0x320] sm:$0xf]  ;;  %v3057_v53 = vor.u32 %v3617_v51, %v3056_v10  ;;  %v3625_v7 = vld [vmem:[#allocation10 + $0x194] sm:$0xf]  ;;  %v3098_v24 = vld [vmem:[#allocation10 + $0x1a4] sm:$0xf0] }
  0xf5   : > { %1938 = vmatpush.bf16.msrb.mxu0 %v2997_v19  ;;  %v3580_v19 = vld [vmem:[#allocation10 + $0x2c] sm:$0xf]  ;;  %v3058_v10 = vld [vmem:[#allocation10 + $0x154] sm:$0xf0]  ;;  %v3675_v51 = vld [vmem:[#allocation10 + $0x324] sm:$0xf] }
  0xf6   : > { %1951 = vmatpush.bf16.msrb.mxu1 %v3157_v28  ;;  %v3198_v28 = vld [vmem:[#allocation10 + $0x26c] sm:$0xf0]  ;;  %v2921_v59 = vor.u32 %v3580_v19, %v2918_v20  ;;  %v3690_v19 = vld [vmem:[#allocation10 + $0x39c] sm:$0xf] }
  0xf7   : > { %1964 = vmatpush.bf16.msrb.mxu2 %v3317_v38  ;;  %v3158_v38 = vld [vmem:[#allocation10 + $0x21c] sm:$0xf0]  ;;  %v3358_v20 = vld [vmem:[#allocation10 + $0x3ac] sm:$0xf0] }
  0xf8   : > { %1977 = vmatpush.bf16.msrb.mxu3 %v3001_v32  ;;  %v3201_v32 = vor.u32 %v3650_v58, %v3198_v28  ;;  %v3361_v22 = vor.u32 %v3690_v19, %v3358_v20  ;;  %v3276_v28 = vld [vmem:[#allocation10 + $0x2f8] sm:$0xf]  ;;  %v3657_v19 = vld [vmem:[#allocation10 + $0x290] sm:$0xf0] }
  0xf9   : > { %1939 = vmatpush.bf16.msrb.mxu0 %v2977_v25  ;;  %v3204_v25 = vld [vmem:[#allocation10 + $0x260] sm:$0xf] }
  0xfa   : > { %1952 = vmatpush.bf16.msrb.mxu1 %v3137_v36  ;;  %v3205_v33 = vor.u32 %v3653_v26, %v3204_v25  ;;  %v3181_v36 = vor.u32 %v3645_v29, %v3178_v30  ;;  %v3101_v25 = vor.u32 %v3625_v7, %v3098_v24  ;;  %v3338_v26 = vld [vmem:[#allocation10 + $0x384] sm:$0xf0]  ;;  %v3104_v29 = vld [vmem:[#allocation10 + $0x198] sm:$0xf]  ;;  %v3628_v30 = vld [vmem:[#allocation10 + $0x1a8] sm:$0xf0] }
  0xfb   : > { %v3258_v7 = vld [vmem:[#allocation10 + $0x2e4] sm:$0xf0]  ;;  %v3024_v24 = vld [vmem:[#allocation10 + $0xf8] sm:$0xf] }
  0xfc   : > { %1978 = vmatpush.bf16.msrb.mxu3 %v2981_v39  ;;  %v3185_v39 = vor.u32 %v3648_v35, %v3184_v34  ;;  %v3667_v34 = vld [vmem:[#allocation10 + $0x2e0] sm:$0xf0]  ;;  %v3620_v35 = vld [vmem:[#allocation10 + $0x16c] sm:$0xf] }
  0xfd   : > { %1940 = vmatpush.bf16.msrb.mxu0 %v2957_v40  ;;  %v3161_v40 = vor.u32 %v3640_v37, %v3158_v38  ;;  %v3078_v38 = vld [vmem:[#allocation10 + $0x17c] sm:$0xf0] }
  0xfe   : > { %1953 = vmatpush.bf16.msrb.mxu1 %v3117_v45  ;;  %v3138_v45 = vld [vmem:[#allocation10 + $0x1f4] sm:$0xf0]  ;;  %v3081_v41 = vor.u32 %v3620_v35, %v3078_v38 }
  0xff   : > { %v3141_v47 = vor.u32 %v3635_v44, %v3138_v45  ;;  %v3623_v44 = vld [vmem:[#allocation10 + $0x180] sm:$0xf0]  ;;  %v3218_v38 = vld [vmem:[#allocation10 + $0x294] sm:$0xf0] }
 0x100   : > { %1979 = vmatpush.bf16.msrb.mxu3 %v2961_v9  ;;  %v3638_v9 = vld [vmem:[#allocation10 + $0x1f8] sm:$0xf0] }
 0x101   : > { %1941 = vmatpush.bf16.msrb.mxu0 %v2937_v50  ;;  %v3145_v50 = vor.u32 %v3638_v9, %v3144_v49  ;;  %v3662_v49 = vld [vmem:[#allocation10 + $0x2b8] sm:$0xf0] }
 0x102   : > { %1954 = vmatpush.bf16.msrb.mxu1 %v3097_v54  ;;  %v3677_v54 = vld [vmem:[#allocation10 + $0x330] sm:$0xf0] }
 0x104   : > { %1980 = vmatpush.bf16.msrb.mxu3 %v2941_v56  ;;  %v3297_v56 = vor.u32 %v3677_v54, %v3296_v52  ;;  %v3064_v54 = vld [vmem:[#allocation10 + $0x148] sm:$0xf] }
 0x105   : > { %1942 = vmatpush.bf16.msrb.mxu0 %v2917_v57  ;;  %v3121_v57 = vor.u32 %v3630_v55, %v3118_v46  ;;  %v3618_v55 = vld [vmem:[#allocation10 + $0x158] sm:$0xf0] }
 0x106   : > { %1955 = vmatpush.bf16.msrb.mxu1 %v3077_v8  ;;  %v3633_v8 = vld [vmem:[#allocation10 + $0x1d0] sm:$0xf0]  ;;  %1965 = vmatpush.bf16.msrb.mxu2 %v3297_v56  ;;  %v3065_v56 = vor.u32 %v3618_v55, %v3064_v54  ;;  %v2944_v54 = vld [vmem:[#allocation10 + $0x58] sm:$0xf]  ;;  %v3588_v55 = vld [vmem:[#allocation10 + $0x68] sm:$0xf0] }
 0x107   : > { %v3125_v58 = vor.u32 %v3633_v8, %v3124_v21  ;;  %v3670_v21 = vld [vmem:[#allocation10 + $0x2fc] sm:$0xf]  ;;  %v3044_v8 = vld [vmem:[#allocation10 + $0x120] sm:$0xf] }
 0x108   : > { %1981 = vmatpush.bf16.msrb.mxu3 %v2921_v59  ;;  %v3672_v59 = vld [vmem:[#allocation10 + $0x308] sm:$0xf0] }
 0x109   : > { %1943 = vmatpush.bf16.msrb.mxu0 %v2897_v23  ;;  %v3277_v23 = vor.u32 %v3672_v59, %v3276_v28  ;;  %v3613_v28 = vld [vmem:[#allocation10 + $0x130] sm:$0xf0] }
 0x10a   : > { %1956 = vmatpush.bf16.msrb.mxu1 %v3057_v53  ;;  %v3298_v53 = vld [vmem:[#allocation10 + $0x334] sm:$0xf0]  ;;  %v3045_v59 = vor.u32 %v3613_v28, %v3044_v8  ;;  %v3583_v28 = vld [vmem:[#allocation10 + $0x40] sm:$0xf0] }
 0x10b   : > { %1966 = vmatpush.bf16.msrb.mxu2 %v3277_v23  ;;  %v3301_v46 = vor.u32 %v3675_v51, %v3298_v53  ;;  %v3665_v23 = vld [vmem:[#allocation10 + $0x2d4] sm:$0xf]  ;;  %v3366_v8 = vld [vmem:[#allocation10 + $0x3b4] sm:$0xf0] }
 0x10c   : > { %1982 = vmatpush.bf16.msrb.mxu3 %v2901_v31 }
 0x10d   : > { %1988 = vmatpush.bf16.msra.mxu0 %v3201_v32  ;;  %v3685_v32 = vld [vmem:[#allocation10 + $0x374] sm:$0xf] }
 0x10e   : > { %2001 = vmatpush.bf16.msra.mxu1 %v3361_v22  ;;  %v3341_v31 = vor.u32 %v3685_v32, %v3338_v26  ;;  %v3278_v22 = vld [vmem:[#allocation10 + $0x30c] sm:$0xf0]  ;;  %v3261_v32 = vor.u32 %v3665_v23, %v3258_v7  ;;  %v3344_v7 = vld [vmem:[#allocation10 + $0x378] sm:$0xf] }
 0x110   : > { %2027 = vmatpush.bf16.msra.mxu3 %v3205_v33  ;;  %v3105_v33 = vor.u32 %v3628_v30, %v3104_v29  ;;  %v3660_v29 = vld [vmem:[#allocation10 + $0x2ac] sm:$0xf]  ;;  %v3238_v30 = vld [vmem:[#allocation10 + $0x2bc] sm:$0xf0] }
 0x111   : > { %1989 = vmatpush.bf16.msra.mxu0 %v3181_v36  ;;  %v3256_v36 = vld [vmem:[#allocation10 + $0x2d0] sm:$0xf] }
 0x112   : > { %2002 = vmatpush.bf16.msra.mxu1 %v3341_v31  ;;  %v3257_v37 = vor.u32 %v3667_v34, %v3256_v36  ;;  %v3241_v31 = vor.u32 %v3660_v29, %v3238_v30  ;;  %v3603_v36 = vld [vmem:[#allocation10 + $0xe0] sm:$0xf0]  ;;  %v3688_v29 = vld [vmem:[#allocation10 + $0x388] sm:$0xf0]  ;;  %v3686_v30 = vld [vmem:[#allocation10 + $0x37c] sm:$0xf] }
 0x114   : > { %2028 = vmatpush.bf16.msra.mxu3 %v3185_v39  ;;  %v3680_v39 = vld [vmem:[#allocation10 + $0x34c] sm:$0xf]  ;;  %1967 = vmatpush.bf16.msrb.mxu2 %v3257_v37  ;;  %v3655_v37 = vld [vmem:[#allocation10 + $0x284] sm:$0xf] }
 0x115   : > { %1990 = vmatpush.bf16.msra.mxu0 %v3161_v40  ;;  %v3318_v40 = vld [vmem:[#allocation10 + $0x35c] sm:$0xf0] }
 0x116   : > { %v3321_v42 = vor.u32 %v3680_v39, %v3318_v40  ;;  %v2984_v39 = vld [vmem:[#allocation10 + $0xa8] sm:$0xf] }
 0x118   : > { %2029 = vmatpush.bf16.msra.mxu3 %v3165_v43  ;;  %v3084_v43 = vld [vmem:[#allocation10 + $0x170] sm:$0xf]  ;;  %2003 = vmatpush.bf16.msra.mxu1 %v3321_v42  ;;  %v3598_v42 = vld [vmem:[#allocation10 + $0xb8] sm:$0xf0] }
 0x119   : > { %1991 = vmatpush.bf16.msra.mxu0 %v3141_v47  ;;  %v3085_v45 = vor.u32 %v3623_v44, %v3084_v43  ;;  %v3236_v47 = vld [vmem:[#allocation10 + $0x2a8] sm:$0xf]  ;;  %v2985_v43 = vor.u32 %v3598_v42, %v2984_v39  ;;  %v2964_v44 = vld [vmem:[#allocation10 + $0x80] sm:$0xf]  ;;  %v3681_v42 = vld [vmem:[#allocation10 + $0x354] sm:$0xf] }
 0x11a   : > { %v3237_v9 = vor.u32 %v3662_v49, %v3236_v47 }
 0x11c   : > { %2030 = vmatpush.bf16.msra.mxu3 %v3145_v50  ;;  %v3615_v50 = vld [vmem:[#allocation10 + $0x144] sm:$0xf]  ;;  %1968 = vmatpush.bf16.msrb.mxu2 %v3237_v9 }
 0x11d   : > { %1992 = vmatpush.bf16.msra.mxu0 %v3121_v57  ;;  %v3061_v52 = vor.u32 %v3615_v50, %v3058_v10  ;;  %v3216_v57 = vld [vmem:[#allocation10 + $0x280] sm:$0xf]  ;;  %2004 = vmatpush.bf16.msra.mxu1 %v3301_v46  ;;  %v2945_v46 = vor.u32 %v3588_v55, %v2944_v54  ;;  %v3678_v54 = vld [vmem:[#allocation10 + $0x338] sm:$0xf0]  ;;  %v3676_v55 = vld [vmem:[#allocation10 + $0x32c] sm:$0xf] }
 0x11e   : > { %v3217_v20 = vor.u32 %v3657_v19, %v3216_v57  ;;  %v2888_v57 = vsel %vm1138_vm12, 1.0, %v4353_v48  ;;  %v3364_v19 = vld [vmem:[#allocation10 + $0x3a0] sm:$0xf] }
 0x120   : > { %2031 = vmatpush.bf16.msra.mxu3 %v3125_v58  ;;  %v3281_v58 = vor.u32 %v3670_v21, %v3278_v22  ;;  %1969 = vmatpush.bf16.msrb.mxu2 %v3217_v20  ;;  %v3693_v20 = vld [vmem:[#allocation10 + $0x3b0] sm:$0xf0]  ;;  %v3691_v21 = vld [vmem:[#allocation10 + $0x3a4] sm:$0xf] }
 0x121   : > { %1993 = vmatpush.bf16.msra.mxu0 %v3101_v25  ;;  %v3608_v25 = vld [vmem:[#allocation10 + $0x108] sm:$0xf0] }
 0x122   : > { %2005 = vmatpush.bf16.msra.mxu1 %v3281_v58  ;;  %v3025_v26 = vor.u32 %v3608_v25, %v3024_v24  ;;  %v2924_v58 = vld [vmem:[#allocation10 + $0x30] sm:$0xf]  ;;  %v3365_v25 = vor.u32 %v3693_v20, %v3364_v19 }
 0x124   : > { %2032 = vmatpush.bf16.msra.mxu3 %v3105_v33  ;;  %2014 = vmatpush.bf16.msra.mxu2 %v3045_v59  ;;  %v3004_v33 = vld [vmem:[#allocation10 + $0xd0] sm:$0xf]  ;;  %v2925_v59 = vor.u32 %v3583_v28, %v2924_v58  ;;  %v3046_v58 = vld [vmem:[#allocation10 + $0x134] sm:$0xf0]  ;;  %v3671_v28 = vld [vmem:[#allocation10 + $0x304] sm:$0xf] }
 0x125   : > { %1994 = vmatpush.bf16.msra.mxu0 %v3081_v41  ;;  %v3005_v34 = vor.u32 %v3603_v36, %v3004_v33  ;;  %v3221_v41 = vor.u32 %v3655_v37, %v3218_v38  ;;  %v3345_v38 = vor.u32 %v3688_v29, %v3344_v7  ;;  %v3264_v29 = vld [vmem:[#allocation10 + $0x2d8] sm:$0xf]  ;;  %v3072_v37 = vld [vmem:[#allocation10 + $0x150] sm:$0xf] }
 0x126   : > { %2006 = vmatpush.bf16.msra.mxu1 %v3261_v32 }
 0x128   : > { %2033 = vmatpush.bf16.msra.mxu3 %v3085_v45  ;;  %2015 = vmatpush.bf16.msra.mxu2 %v3025_v26  ;;  %v3593_v45 = vld [vmem:[#allocation10 + $0x90] sm:$0xf0]  ;;  %v3369_v26 = vor.u32 %v3691_v21, %v3366_v8  ;;  %v3611_v8 = vld [vmem:[#allocation10 + $0x124] sm:$0xf] }
 0x129   : > { %1995 = vmatpush.bf16.msra.mxu0 %v3061_v52  ;;  %v2965_v47 = vor.u32 %v3593_v45, %v2964_v44  ;;  %v1147_v52 = vmul.f32 0.95, %v4309_v11 }
 0x12a   : > { %2007 = vmatpush.bf16.msra.mxu1 %v3241_v31  ;;  %v3346_v31 = vld [vmem:[#allocation10 + $0x38c] sm:$0xf0] }
 0x12b   : > { %v3349_v39 = vor.u32 %v3686_v30, %v3346_v31  ;;  %v3668_v30 = vld [vmem:[#allocation10 + $0x2e8] sm:$0xf0] }
 0x12c   : > { %2034 = vmatpush.bf16.msra.mxu3 %v3065_v56  ;;  %2016 = vmatpush.bf16.msra.mxu2 %v3005_v34  ;;  %v2904_v34 = vld [vmem:[#allocation10 + $0x8] sm:$0xf] }
 0x12e   : > { %2008 = vmatpush.bf16.msra.mxu1 %v3221_v41  ;;  %v3683_v41 = vld [vmem:[#allocation10 + $0x360] sm:$0xf0] }
 0x130   : > { %2017 = vmatpush.bf16.msra.mxu2 %v2985_v43  ;;  %v3326_v43 = vld [vmem:[#allocation10 + $0x364] sm:$0xf0] }
 0x134   : > { %2018 = vmatpush.bf16.msra.mxu2 %v2965_v47  ;;  %v1148_v47 = vmul.f32 0.95, %v4305_v12  ;;  %v3284_v12 = vld [vmem:[#allocation10 + $0x300] sm:$0xf] }
 0x138   : > { %2019 = vmatpush.bf16.msra.mxu2 %v2945_v46  ;;  %v3306_v46 = vld [vmem:[#allocation10 + $0x33c] sm:$0xf0] }
 0x139   : > { %v3309_v20 = vor.u32 %v3676_v55, %v3306_v46 }
 0x13c   : > { %2020 = vmatpush.bf16.msra.mxu2 %v2925_v59  ;;  %v3286_v59 = vld [vmem:[#allocation10 + $0x314] sm:$0xf0] }
 0x149   : > { %v991_v35 = vpop.f32.mrf.mxu0 }
 0x14a   : > { %v1004_v40 = vpop.f32.mrf.mxu1 }
 0x14b   : > { %v1005_v49 = vadd.f32 %v1004_v40, %v991_v35  ;;  %v3578_v35 = vld [vmem:[#allocation10 + $0x18] sm:$0xf0]  ;;  %v3324_v40 = vld [vmem:[#allocation10 + $0x350] sm:$0xf] }
 0x151   : > { %v1017_v9 = vpop.f32.mrf.mxu2  ;;  %v993_v50 = vpop.f32.mrf.mxu0 }
 0x152   : > { %v1018_v10 = vadd.f32 %v1017_v9, %v1005_v49  ;;  %v1030_v51 = vpop.f32.mrf.mxu3  ;;  %v1006_v53 = vpop.f32.mrf.mxu1  ;;  %v3325_v9 = vor.u32 %v3683_v41, %v3324_v40  ;;  %v3329_v50 = vor.u32 %v3681_v42, %v3326_v43  ;;  %v3266_v40 = vld [vmem:[#allocation10 + $0x2ec] sm:$0xf0]  ;;  %v3265_v41 = vor.u32 %v3668_v30, %v3264_v29 }
 0x154   : > { %v1031_v56 = vadd.f32 %v1030_v51, %v1018_v10  ;;  %v3304_v10 = vld [vmem:[#allocation10 + $0x328] sm:$0xf] }
 0x155   : > { %v3305_v19 = vor.u32 %v3678_v54, %v3304_v10 }
 0x156   : > { %v1150_v22 = vadd.f32 %v1147_v52, %v1031_v56 }
 0x158   : > { %v4670_v11 = vsub.f32 %v1150_v22, %v2888_v57   ;;  %v2889_v57 = vsel %vm1139_vm15, 1.0, %v4353_v48  ;;  %v3673_v22 = vld [vmem:[#allocation10 + $0x310] sm:$0xf0] }
 0x159   : > { %v1019_v24 = vpop.f32.mrf.mxu2  ;;  %v1043_v32 = vpop.f32.mrf.mxu0 }
 0x15a   : > { %v4877_v23 = vmov %v4670_v11  ;;  %v1032_v33 = vpop.f32.mrf.mxu3  ;;  %v1056_v36 = vpop.f32.mrf.mxu1  ;;  %v2905_v11 = vor.u32 %v3578_v35, %v2904_v34  ;;  %v3289_v34 = vor.u32 %v3671_v28, %v3286_v59  ;;  %v3606_v35 = vld [vmem:[#allocation10 + $0xfc] sm:$0xf]  ;;  %v3052_v59 = vld [vmem:[#allocation10 + $0x128] sm:$0xf] }
 0x15b   : > { %vm1156_vm13 = vcmp.gt.f32.partialorder %v4877_v23, 1.0  ;;  %v1057_v44 = vadd.f32 %v1056_v36, %v1043_v32  ;;  %v3049_v36 = vor.u32 %v3611_v8, %v3046_v58  ;;  %v3656_v8 = vld [vmem:[#allocation10 + $0x28c] sm:$0xf]  ;;  %v3226_v58 = vld [vmem:[#allocation10 + $0x29c] sm:$0xf0]  ;;  %2332 = vst [vmem:[#allocation22] sm:$0xff] (%p4774_p0), %v4877_v23 }
 0x15c   : > { %vm4673_vm14 = vmpackc.low %vm1156_vm13, %vm1156_vm13  ;;  %2021 = vmatpush.bf16.msra.mxu2 %v2905_v11  ;;  %v3026_v11 = vld [vmem:[#allocation10 + $0x10c] sm:$0xf0]  ;;  %v3229_v30 = vor.u32 %v3656_v8, %v3226_v58  ;;  %v3146_v8 = vld [vmem:[#allocation10 + $0x1fc] sm:$0xf0] }
 0x15d   : > { %3375 = vmatmul.msk.bf16.vlgmr.msrb.gmra.mxu0 %vm4673_vm14, %v4354_v27  ;;  %3381 = vmatmul.msk.bf16.vlgmr.msrb.gmra.mxu3 %vm4673_vm14, %v4354_v27  ;;  %v3029_v42 = vor.u32 %v3606_v35, %v3026_v11  ;;  %v2966_v35 = vld [vmem:[#allocation10 + $0x94] sm:$0xf0]  ;;  %v3032_v11 = vld [vmem:[#allocation10 + $0x100] sm:$0xf] }
 0x15e   : > { %2040 = vmatpush.bf16.msrb.mxu0 %v3365_v25  ;;  %2079 = vmatpush.bf16.msrb.mxu3 %v3369_v26  ;;  %v3285_v26 = vor.u32 %v3673_v22, %v3284_v12  ;;  %v3596_v12 = vld [vmem:[#allocation10 + $0xac] sm:$0xf]  ;;  %v2986_v22 = vld [vmem:[#allocation10 + $0xbc] sm:$0xf0] }
 0x15f   : > { %v2989_v29 = vor.u32 %v3596_v12, %v2986_v22  ;;  %v3636_v22 = vld [vmem:[#allocation10 + $0x1ec] sm:$0xf] }
 0x161   : > { %v1069_v45 = vpop.f32.mrf.mxu2  ;;  %v1045_v49 = vpop.f32.mrf.mxu0 }
 0x162   : > { %2041 = vmatpush.bf16.msrb.mxu0 %v3345_v38  ;;  %2080 = vmatpush.bf16.msrb.mxu3 %v3349_v39  ;;  %v1070_v51 = vadd.f32 %v1069_v45, %v1057_v44  ;;  %v1082_v52 = vpop.f32.mrf.mxu3  ;;  %v1058_v53 = vpop.f32.mrf.mxu1  ;;  %v3666_v39 = vld [vmem:[#allocation10 + $0x2dc] sm:$0xf]  ;;  %v3244_v44 = vld [vmem:[#allocation10 + $0x2b0] sm:$0xf]  ;;  %v3663_v45 = vld [vmem:[#allocation10 + $0x2c0] sm:$0xf0] }
 0x163   : > { %v3269_v43 = vor.u32 %v3666_v39, %v3266_v40  ;;  %v3006_v49 = vld [vmem:[#allocation10 + $0xe4] sm:$0xf0]  ;;  %v3245_v54 = vor.u32 %v3663_v45, %v3244_v44  ;;  %v3609_v40 = vld [vmem:[#allocation10 + $0x110] sm:$0xf0]  ;;  %v3646_v45 = vld [vmem:[#allocation10 + $0x23c] sm:$0xf] }
 0x164   : > { %v1083_v56 = vadd.f32 %v1082_v52, %v1070_v51  ;;  %v1149_v52 = vmul.f32 0.95, %v4301_v13 }
 0x166   : > { %2042 = vmatpush.bf16.msrb.mxu0 %v3325_v9  ;;  %2081 = vmatpush.bf16.msrb.mxu3 %v3329_v50  ;;  %v1151_v21 = vadd.f32 %v1148_v47, %v1083_v56  ;;  %v3601_v47 = vld [vmem:[#allocation10 + $0xd4] sm:$0xf]  ;;  %v3246_v50 = vld [vmem:[#allocation10 + $0x2c4] sm:$0xf0] }
 0x167   : > { %v3661_v9 = vld [vmem:[#allocation10 + $0x2b4] sm:$0xf] }
 0x168   : > { %v4686_v7 = vsub.f32 %v1151_v21, %v2889_v57   ;;  %v3009_v57 = vor.u32 %v3601_v47, %v3006_v49  ;;  %v3658_v21 = vld [vmem:[#allocation10 + $0x298] sm:$0xf0]  ;;  %v3186_v47 = vld [vmem:[#allocation10 + $0x24c] sm:$0xf0] }
 0x169   : > { %v1071_v32 = vpop.f32.mrf.mxu2  ;;  %v1095_v25 = vpop.f32.mrf.mxu0 }
 0x16a   : > { %v4880_v24 = vmov %v4686_v7  ;;  %2043 = vmatpush.bf16.msrb.mxu0 %v3305_v19  ;;  %2082 = vmatpush.bf16.msrb.mxu3 %v3309_v20  ;;  %v1084_v31 = vpop.f32.mrf.mxu3  ;;  %v1108_v33 = vpop.f32.mrf.mxu1  ;;  %v3249_v19 = vor.u32 %v3661_v9, %v3246_v50  ;;  %v3224_v20 = vld [vmem:[#allocation10 + $0x288] sm:$0xf]  ;;  %v3614_v7 = vld [vmem:[#allocation10 + $0x138] sm:$0xf0]  ;;  %v2890_v32 = vsel %vm1140_vm2, 1.0, %v4353_v48  ;;  %v3033_v9 = vor.u32 %v3609_v40, %v3032_v11 }
 0x16b   : > { %vm1157_vm0 = vcmp.gt.f32.partialorder %v4880_v24, 1.0  ;;  %v1109_v10 = vadd.f32 %v1108_v33, %v1095_v25  ;;  %v3225_v25 = vor.u32 %v3658_v21, %v3224_v20  ;;  %v3651_v31 = vld [vmem:[#allocation10 + $0x264] sm:$0xf]  ;;  %v3206_v33 = vld [vmem:[#allocation10 + $0x274] sm:$0xf0]  ;;  %2333 = vst [vmem:[#allocation22 + $0x8] sm:$0xff] (%p4774_p0), %v4880_v24 }
 0x16c   : > { %vm4689_vm1 = vmpackc.low %vm1157_vm0, %vm1157_vm0  ;;  %v2946_v50 = vld [vmem:[#allocation10 + $0x6c] sm:$0xf0]  ;;  %v3599_v20 = vld [vmem:[#allocation10 + $0xc0] sm:$0xf0] }
 0x16d   : > { %3377 = vmatmul.msk.bf16.vlgmr.msrb.gmra.mxu1 %vm4689_vm1, %v4354_v27  ;;  %3383 = vmatmul.msk.bf16.vlgmr.msra.gmra.mxu0 %vm4689_vm1, %v4354_v27  ;;  %v3589_v11 = vld [vmem:[#allocation10 + $0x70] sm:$0xf0]  ;;  %v3192_v40 = vld [vmem:[#allocation10 + $0x240] sm:$0xf] }
 0x16e   : > { %3389 = vmatmul.msk.bf16.vlgmr.msra.gmra.mxu3 %vm4689_vm1, %v4354_v27  ;;  %2044 = vmatpush.bf16.msrb.mxu0 %v3285_v26 }
 0x16f   : > { %2053 = vmatpush.bf16.msrb.mxu1 %v3049_v36  ;;  %2083 = vmatpush.bf16.msrb.mxu3 %v3289_v34  ;;  %v3053_v36 = vor.u32 %v3614_v7, %v3052_v59  ;;  %v3591_v34 = vld [vmem:[#allocation10 + $0x84] sm:$0xf]  ;;  %v2906_v59 = vld [vmem:[#allocation10 + $0x1c] sm:$0xf0]  ;;  %v2972_v7 = vld [vmem:[#allocation10 + $0x88] sm:$0xf] }
 0x170   : > { %v2969_v44 = vor.u32 %v3591_v34, %v2966_v35  ;;  %v2952_v35 = vld [vmem:[#allocation10 + $0x60] sm:$0xf] }
 0x171   : > { %v1121_v51 = vpop.f32.mrf.mxu2  ;;  %v1097_v53 = vpop.f32.mrf.mxu0 }
 0x172   : > { %2045 = vmatpush.bf16.msrb.mxu0 %v3265_v41  ;;  %v1122_v55 = vadd.f32 %v1121_v51, %v1109_v10  ;;  %v1134_v46 = vpop.f32.mrf.mxu3  ;;  %v1110_v56 = vpop.f32.mrf.mxu1  ;;  %v3012_v10 = vld [vmem:[#allocation10 + $0xd8] sm:$0xf]  ;;  %v3604_v51 = vld [vmem:[#allocation10 + $0xe8] sm:$0xf0] }
 0x173   : > { %2054 = vmatpush.bf16.msrb.mxu1 %v3029_v42  ;;  %2084 = vmatpush.bf16.msrb.mxu3 %v3269_v43  ;;  %v3209_v42 = vor.u32 %v3651_v31, %v3206_v33  ;;  %v3581_v56 = vld [vmem:[#allocation10 + $0x34] sm:$0xf]  ;;  %v3631_v31 = vld [vmem:[#allocation10 + $0x1c4] sm:$0xf]  ;;  %v3126_v33 = vld [vmem:[#allocation10 + $0x1d4] sm:$0xf0] }
 0x174   : > { %v1135_v28 = vadd.f32 %v1134_v46, %v1122_v55  ;;  %v3166_v55 = vld [vmem:[#allocation10 + $0x224] sm:$0xf0]  ;;  %v3013_v46 = vor.u32 %v3604_v51, %v3012_v10  ;;  %v3644_v10 = vld [vmem:[#allocation10 + $0x228] sm:$0xf0] }
 0x176   : > { %2046 = vmatpush.bf16.msrb.mxu0 %v3245_v54  ;;  %v1152_v26 = vadd.f32 %v1149_v52, %v1135_v28  ;;  %v3189_v52 = vor.u32 %v3646_v45, %v3186_v47  ;;  %v3641_v54 = vld [vmem:[#allocation10 + $0x214] sm:$0xf]  ;;  %v3576_v28 = vld [vmem:[#allocation10 + $0xc] sm:$0xf]  ;;  %v2953_v45 = vor.u32 %v3589_v11, %v2952_v35  ;;  %v3332_v35 = vld [vmem:[#allocation10 + $0x358] sm:$0xf] }
 0x177   : > { %2055 = vmatpush.bf16.msrb.mxu1 %v3009_v57  ;;  %2085 = vmatpush.bf16.msrb.mxu3 %v3249_v19  ;;  %v2926_v57 = vld [vmem:[#allocation10 + $0x44] sm:$0xf0]  ;;  %v2992_v19 = vld [vmem:[#allocation10 + $0xb0] sm:$0xf]  ;;  %v3169_v21 = vor.u32 %v3641_v54, %v3166_v55  ;;  %v3684_v11 = vld [vmem:[#allocation10 + $0x368] sm:$0xf0] }
 0x178   : > { %v4707_v13 = vsub.f32 %v1152_v26, %v2890_v32   ;;  %v2929_v12 = vor.u32 %v3581_v56, %v2926_v57  ;;  %v2993_v58 = vor.u32 %v3599_v20, %v2992_v19  ;;  %v3594_v32 = vld [vmem:[#allocation10 + $0x98] sm:$0xf0]  ;;  %v3579_v56 = vld [vmem:[#allocation10 + $0x20] sm:$0xf0]  ;;  %v3152_v57 = vld [vmem:[#allocation10 + $0x1f0] sm:$0xf] }
 0x179   : > { %v1123_v41 = vpop.f32.mrf.mxu2  ;;  %v3654_v26 = vld [vmem:[#allocation10 + $0x278] sm:$0xf0]  ;;  %v3639_v19 = vld [vmem:[#allocation10 + $0x200] sm:$0xf0] }
 0x17a   : > { %v4883_v39 = vmov %v4707_v13  ;;  %2047 = vmatpush.bf16.msrb.mxu0 %v3225_v25  ;;  %v1136_v43 = vpop.f32.mrf.mxu3  ;;  %v3586_v13 = vld [vmem:[#allocation10 + $0x5c] sm:$0xf]  ;;  %v3212_v25 = vld [vmem:[#allocation10 + $0x268] sm:$0xf]  ;;  %v3649_v41 = vld [vmem:[#allocation10 + $0x250] sm:$0xf0] }
 0x17b   : > { %vm1158_vm3 = vcmp.gt.f32.partialorder %v4883_v39, 1.0  ;;  %2056 = vmatpush.bf16.msrb.mxu1 %v2989_v29  ;;  %2086 = vmatpush.bf16.msrb.mxu3 %v3229_v30  ;;  %v2949_v53 = vor.u32 %v3586_v13, %v2946_v50  ;;  %v3149_v29 = vor.u32 %v3636_v22, %v3146_v8  ;;  %v2909_v30 = vor.u32 %v3576_v28, %v2906_v59  ;;  %v3626_v43 = vld [vmem:[#allocation10 + $0x19c] sm:$0xf]  ;;  %v3584_v13 = vld [vmem:[#allocation10 + $0x48] sm:$0xf0] }
 0x17c   : > { %vm4710_vm4 = vmpackc.low %vm1158_vm3, %vm1158_vm3  ;;  %v3213_v34 = vor.u32 %v3654_v26, %v3212_v25  ;;  %v3193_v47 = vor.u32 %v3649_v41, %v3192_v40  ;;  %v3172_v50 = vld [vmem:[#allocation10 + $0x218] sm:$0xf]  ;;  %v3153_v8 = vor.u32 %v3639_v19, %v3152_v57  ;;  %v3694_v28 = vld [vmem:[#allocation10 + $0x3b8] sm:$0xf0]  ;;  %2334 = vst [vmem:[#allocation22 + $0x10] sm:$0xff] (%p4774_p0), %v4883_v39 }
 0x17d   : > { %3379 = vmatmul.msk.bf16.vlgmr.msrb.gmra.mxu2 %vm4710_vm4, %v4354_v27  ;;  %3385 = vmatmul.msk.bf16.vlgmr.msra.gmra.mxu1 %vm4710_vm4, %v4354_v27  ;;  %v3173_v55 = vor.u32 %v3644_v10, %v3172_v50  ;;  %v3132_v59 = vld [vmem:[#allocation10 + $0x1c8] sm:$0xf]  ;;  %v3092_v40 = vld [vmem:[#allocation10 + $0x178] sm:$0xf]  ;;  %v3624_v41 = vld [vmem:[#allocation10 + $0x188] sm:$0xf0] }
 0x17e   : > { %2092 = vmatpush.bf16.msra.mxu0 %v3053_v36  ;;  %2066 = vmatpush.bf16.msrb.mxu2 %v3209_v42  ;;  %v2973_v36 = vor.u32 %v3594_v32, %v2972_v7  ;;  %v3129_v42 = vor.u32 %v3631_v31, %v3126_v33  ;;  %v3634_v7 = vld [vmem:[#allocation10 + $0x1d8] sm:$0xf0]  ;;  %v3112_v31 = vld [vmem:[#allocation10 + $0x1a0] sm:$0xf]  ;;  %v3629_v33 = vld [vmem:[#allocation10 + $0x1b0] sm:$0xf0] }
 0x17f   : > { %3391 = vmatmul.msk.bf16.vlgmr.msrb.gmra.mxu0 %vm4710_vm4, %v4354_v27  ;;  %2057 = vmatpush.bf16.msrb.mxu1 %v2969_v44  ;;  %v3106_v44 = vld [vmem:[#allocation10 + $0x1ac] sm:$0xf0]  ;;  %v3133_v26 = vor.u32 %v3634_v7, %v3132_v59  ;;  %v3292_v50 = vld [vmem:[#allocation10 + $0x308] sm:$0xf]  ;;  %v3674_v10 = vld [vmem:[#allocation10 + $0x318] sm:$0xf0] }
 0x180   : > { %3397 = vmatmul.msk.bf16.vlgmr.msrb.gmra.mxu3 %vm4710_vm4, %v4354_v27  ;;  %v3109_v51 = vor.u32 %v3626_v43, %v3106_v44  ;;  %v3093_v43 = vor.u32 %v3624_v41, %v3092_v40  ;;  %v3312_v44 = vld [vmem:[#allocation10 + $0x330] sm:$0xf]  ;;  %v3659_v19 = vld [vmem:[#allocation10 + $0x2a0] sm:$0xf0]  ;;  %v3702_v7 = vld [vmem:[#allocation11 + $0x38] sm:$0xff]  ;;  %v3405_v40 = vsel %vm2132_vm5, 1.0, %v4353_v48 }
 0x181   : > { %v3232_v57 = vld [vmem:[#allocation10 + $0x290] sm:$0xf]  ;;  %2300 = vmatpush.bf16.msra.mxu3 %v3702_v7  ;;  %2374 = dma.vmem_to_hbm [thread:$0]  (%p4774_p0), %s2370_s12, 384, %s2372_s11, [#allocation21]  }
 0x182   : > { %2093 = vmatpush.bf16.msra.mxu0 %v3033_v9  ;;  %2067 = vmatpush.bf16.msrb.mxu2 %v3189_v52  ;;  %v2932_v9 = vld [vmem:[#allocation10 + $0x38] sm:$0xf]  ;;  %v3621_v52 = vld [vmem:[#allocation10 + $0x174] sm:$0xf] }
 0x183   : > { %2058 = vmatpush.bf16.msrb.mxu1 %v2949_v53  ;;  %v3086_v53 = vld [vmem:[#allocation10 + $0x184] sm:$0xf0]  ;;  %v2933_v54 = vor.u32 %v3584_v13, %v2932_v9 }
 0x184   : > { %v3089_v20 = vor.u32 %v3621_v52, %v3086_v53  ;;  %v3272_v52 = vld [vmem:[#allocation10 + $0x2e0] sm:$0xf]  ;;  %v3669_v53 = vld [vmem:[#allocation10 + $0x2f0] sm:$0xf0] }
 0x186   : > { %2094 = vmatpush.bf16.msra.mxu0 %v3013_v46  ;;  %2068 = vmatpush.bf16.msrb.mxu2 %v3169_v21  ;;  %v2912_v46 = vld [vmem:[#allocation10 + $0x10] sm:$0xf]  ;;  %v3616_v21 = vld [vmem:[#allocation10 + $0x14c] sm:$0xf] }
 0x187   : > { %2059 = vmatpush.bf16.msrb.mxu1 %v2929_v12  ;;  %v3066_v12 = vld [vmem:[#allocation10 + $0x15c] sm:$0xf0]  ;;  %v2913_v22 = vor.u32 %v3579_v56, %v2912_v46  ;;  %v3664_v46 = vld [vmem:[#allocation10 + $0x2c8] sm:$0xf0] }
 0x188   : > { %v3069_v32 = vor.u32 %v3616_v21, %v3066_v12 }
 0x18a   : > { %2095 = vmatpush.bf16.msra.mxu0 %v2993_v58  ;;  %2069 = vmatpush.bf16.msrb.mxu2 %v3149_v29  ;;  %v3372_v58 = vld [vmem:[#allocation10 + $0x3a8] sm:$0xf]  ;;  %v3352_v29 = vld [vmem:[#allocation10 + $0x380] sm:$0xf] }
 0x18b   : > { %2060 = vmatpush.bf16.msrb.mxu1 %v2909_v30  ;;  %v3373_v25 = vor.u32 %v3694_v28, %v3372_v58  ;;  %v3689_v30 = vld [vmem:[#allocation10 + $0x390] sm:$0xf0] }
 0x18d   : > { %3387 = vmatmul.msk.bf16.vlgmr.msra.gmra.mxu2 %vm4673_vm14, %v4354_v27 }
 0x18e   : > { %2096 = vmatpush.bf16.msra.mxu0 %v2973_v36  ;;  %3393 = vmatmul.msk.bf16.vlgmr.msrb.gmra.mxu1 %vm4673_vm14, %v4354_v27  ;;  %v3353_v36 = vor.u32 %v3689_v30, %v3352_v29  ;;  %v3700_v30 = vld [vmem:[#allocation11 + $0x28] sm:$0xff] }
 0x18f   : > { %2105 = vmatpush.bf16.msra.mxu1 %v3213_v34  ;;  %2070 = vmatpush.bf16.msrb.mxu2 %v3129_v42  ;;  %v3113_v34 = vor.u32 %v3629_v33, %v3112_v31  ;;  %v3333_v42 = vor.u32 %v3684_v11, %v3332_v35  ;;  %v3699_v31 = vld [vmem:[#allocation11 + $0x20] sm:$0xff]  ;;  %v2141_v33 = vmul.f32 0.95, %v4293_v15 }
 0x192   : > { %2097 = vmatpush.bf16.msra.mxu0 %v2953_v45  ;;  %v3679_v45 = vld [vmem:[#allocation10 + $0x340] sm:$0xf0] }
 0x193   : > { %2106 = vmatpush.bf16.msra.mxu1 %v3193_v47  ;;  %2071 = vmatpush.bf16.msrb.mxu2 %v3109_v51  ;;  %v3619_v47 = vld [vmem:[#allocation10 + $0x160] sm:$0xf0]  ;;  %v3313_v9 = vor.u32 %v3679_v45, %v3312_v44  ;;  %v3293_v51 = vor.u32 %v3674_v10, %v3292_v50  ;;  %v3697_v45 = vld [vmem:[#allocation11 + $0x10] sm:$0xff] }
 0x194   : > { %v3073_v13 = vor.u32 %v3619_v47, %v3072_v37  ;;  %v3404_v47 = vsel %vm2131_vm6, 1.0, %v4353_v48 }
 0x196   : > { %2098 = vmatpush.bf16.msra.mxu0 %v2933_v54  ;;  %v3273_v54 = vor.u32 %v3669_v53, %v3272_v52  ;;  %v3710_v53 = vld [vmem:[#allocation11 + $0x78] sm:$0xff] }
 0x197   : > { %2107 = vmatpush.bf16.msra.mxu1 %v3173_v55  ;;  %2072 = vmatpush.bf16.msrb.mxu2 %v3089_v20  ;;  %v3252_v55 = vld [vmem:[#allocation10 + $0x2b8] sm:$0xf]  ;;  %v3233_v20 = vor.u32 %v3659_v19, %v3232_v57  ;;  %v3708_v57 = vld [vmem:[#allocation11 + $0x68] sm:$0xff] }
 0x198   : > { %v3253_v56 = vor.u32 %v3664_v46, %v3252_v55  ;;  %v3709_v55 = vld [vmem:[#allocation11 + $0x70] sm:$0xff] }
 0x19a   : > { %2099 = vmatpush.bf16.msra.mxu0 %v2913_v22 }
 0x19b   : > { %2108 = vmatpush.bf16.msra.mxu1 %v3153_v8  ;;  %2073 = vmatpush.bf16.msrb.mxu2 %v3069_v32  ;;  %v3701_v32 = vld [vmem:[#allocation11 + $0x30] sm:$0xff] }
 0x19c   : > { %2301 = vmatpush.bf16.msra.mxu3 %v3701_v32  ;;  %v3705_v32 = vld [vmem:[#allocation11 + $0x50] sm:$0xff] }
 0x19d   : > { %3399 = vmatmul.msk.bf16.vlgmr.msra.gmra.mxu0 %vm4673_vm14, %v4354_v27 }
 0x19e   : > { %3395 = vmatmul.msk.bf16.vlgmr.msrb.gmra.mxu2 %vm4689_vm1, %v4354_v27  ;;  %2313 = vmatpush.bf16.msrb.mxu0 %v3710_v53 }
 0x19f   : > { %2118 = vmatpush.bf16.msra.mxu2 %v3373_v25  ;;  %2109 = vmatpush.bf16.msra.mxu1 %v3133_v26 }
 0x1a0   : > { %2302 = vmatpush.bf16.msra.mxu3 %v3700_v30 }
 0x1a2   : > { %2314 = vmatpush.bf16.msrb.mxu0 %v3709_v55 }
 0x1a3   : > { %2119 = vmatpush.bf16.msra.mxu2 %v3353_v36  ;;  %2110 = vmatpush.bf16.msra.mxu1 %v3113_v34  ;;  %v3698_v34 = vld [vmem:[#allocation11 + $0x18] sm:$0xff] }
 0x1a4   : > { %2303 = vmatpush.bf16.msra.mxu3 %v3699_v31  ;;  %v2155_v31 = vmul.f32 0.95, %v4285_v17 }
 0x1a6   : > { %2315 = vmatpush.bf16.msrb.mxu0 %v3708_v57 }
 0x1a7   : > { %2120 = vmatpush.bf16.msra.mxu2 %v3333_v42  ;;  %2111 = vmatpush.bf16.msra.mxu1 %v3093_v43  ;;  %v2140_v43 = vmul.f32 0.95, %v4297_v14 }
 0x1a8   : > { %2304 = vmatpush.bf16.msra.mxu3 %v3698_v34 }
 0x1ab   : > { %2121 = vmatpush.bf16.msra.mxu2 %v3313_v9  ;;  %2112 = vmatpush.bf16.msra.mxu1 %v3073_v13 }
 0x1ac   : > { %2305 = vmatpush.bf16.msra.mxu3 %v3697_v45 }
 0x1ae   : > { %3401 = vmatmul.msk.bf16.vlgmr.msra.gmra.mxu1 %vm4689_vm1, %v4354_v27 }
 0x1af   : > { %2122 = vmatpush.bf16.msra.mxu2 %v3293_v51  ;;  %v3696_v51 = vld [vmem:[#allocation11 + $0x8] sm:$0xff] }
 0x1b0   : > { %2306 = vmatpush.bf16.msra.mxu3 %v3696_v51 }
 0x1b3   : > { %2123 = vmatpush.bf16.msra.mxu2 %v3273_v54  ;;  %v3695_v54 = vld [vmem:[#allocation11] sm:$0xff] }
 0x1b4   : > { %2307 = vmatpush.bf16.msra.mxu3 %v3695_v54 }
 0x1b7   : > { %2124 = vmatpush.bf16.msra.mxu2 %v3253_v56 }
 0x1bb   : > { %2125 = vmatpush.bf16.msra.mxu2 %v3233_v20  ;;  %v3707_v20 = vld [vmem:[#allocation11 + $0x60] sm:$0xff] }
 0x1bc   : > { %2316 = vmatpush.bf16.msrb.mxu0 %v3707_v20 }
 0x1be   : > { %3403 = vmatmul.msk.bf16.vlgmr.msra.gmra.mxu2 %vm4710_vm4, %v4354_v27 }
 0x1da   : > { %v1945_v21 = vpop.f32.mrf.mxu0 }
 0x1e0   : > { %v1984_v12 = vpop.f32.mrf.mxu3 }
 0x1e2   : > { %v1947_v22 = vpop.f32.mrf.mxu0 }
 0x1e8   : > { %v1986_v38 = vpop.f32.mrf.mxu3 }
 0x1e9   : > { %v3406_v38 = vsel %vm2133_vm7, 1.0, %v4353_v48 }
 0x1ea   : > { %v1958_v8 = vpop.f32.mrf.mxu1  ;;  %v1997_v58 = vpop.f32.mrf.mxu0 }
 0x1eb   : > { %v1959_v28 = vadd.f32 %v1958_v8, %v1945_v21  ;;  %v1998_v59 = vadd.f32 %v1997_v58, %v1984_v12  ;;  %v2142_v12 = vmul.f32 0.95, %v4289_v16  ;;  %v3706_v8 = vld [vmem:[#allocation11 + $0x58] sm:$0xff] }
 0x1ec   : > { %2317 = vmatpush.bf16.msrb.mxu0 %v3706_v8  ;;  %v4901_v8 = vmov %v4866_v61 }
 0x1f0   : > { %2318 = vmatpush.bf16.msrb.mxu0 %v3705_v32 }
 0x1f1   : > { %v2036_v25 = vpop.f32.mrf.mxu3 }
 0x1f2   : > { %v1960_v26 = vpop.f32.mrf.mxu1  ;;  %v1999_v29 = vpop.f32.mrf.mxu0 }
 0x1f3   : > { %v3704_v26 = vld [vmem:[#allocation11 + $0x48] sm:$0xff] }
 0x1f4   : > { %2319 = vmatpush.bf16.msrb.mxu0 %v3704_v26 }
 0x1f9   : > { %v2038_v49 = vpop.f32.mrf.mxu3 }
 0x1fa   : > { %v2010_v36 = vpop.f32.mrf.mxu1  ;;  %v3703_v49 = vld [vmem:[#allocation11 + $0x40] sm:$0xff] }
 0x1fb   : > { %v2011_v35 = vadd.f32 %v2010_v36, %v1998_v59  ;;  %v3407_v36 = vsel %vm2149_vm8, 1.0, %v4353_v48  ;;  %2320 = vmatpush.bf16.msrb.mxu0 %v3703_v49 }
 0x1fc   : > { %v2049_v11 = vpop.f32.mrf.mxu0 }
 0x1fd   : > { %v2144_v41 = vadd.f32 %v2141_v33, %v2011_v35 }
 0x1ff   : > { %v4747_v15 = vsub.f32 %v2144_v41, %v3405_v40  }
 0x200   : > { %v1971_v44 = vpop.f32.mrf.mxu2 }
 0x201   : > { %v4886_v42 = vmov %v4747_v15  ;;  %v1972_v37 = vadd.f32 %v1971_v44, %v1959_v28 }
 0x202   : > { %v2012_v13 = vpop.f32.mrf.mxu1  ;;  %2336 = vst [vmem:[#allocation23 + $0x8] sm:$0xff] (%p4774_p0), %v4886_v42 }
 0x203   : > { %v2088_v9 = vpop.f32.mrf.mxu3  ;;  %v2143_v50 = vadd.f32 %v2140_v43, %v1972_v37  ;;  %v2156_v43 = vmul.f32 0.95, %v4281_v18  ;;  %v3408_v37 = vsel %vm2150_vm11, 1.0, %v4353_v48 }
 0x204   : > { %v2051_v10 = vpop.f32.mrf.mxu0 }
 0x205   : > { %v4752_v14 = vsub.f32 %v2143_v50, %v3404_v47   ;;  %v2202_v10 = vperm.slane %v4496_v6, 0 }
 0x207   : > { %v4887_v52 = vmov %v4752_v14 }
 0x208   : > { %v1973_v15 = vpop.f32.mrf.mxu2  ;;  %2335 = vst [vmem:[#allocation23] sm:$0xff] (%p4774_p0), %v4887_v52 }
 0x20b   : > { %v2090_v46 = vpop.f32.mrf.mxu3  ;;  %v2062_v56 = vpop.f32.mrf.mxu1 }
 0x210   : > { %v2023_v19 = vpop.f32.mrf.mxu2 }
 0x211   : > { %v2037_v21 = vadd.f32 %v2036_v25, %v2023_v19 }
 0x213   : > { %v2050_v14 = vadd.f32 %v2049_v11, %v2037_v21  ;;  %v2064_v22 = vpop.f32.mrf.mxu1 }
 0x215   : > { %v2145_v58 = vadd.f32 %v2142_v12, %v2050_v14  ;;  %v4895_v14 = vmov %v4887_v52  ;;  %v4897_v12 = vmov %v4880_v24 }
 0x217   : > { %v4757_v16 = vsub.f32 %v2145_v58, %v3406_v38  }
 0x218   : > { %v2025_v7 = vpop.f32.mrf.mxu2 }
 0x219   : > { %v4888_v28 = vmov %v4757_v16  ;;  %v4902_v7 = vmov %v4865_v60 }
 0x21a   : > { %v2101_v59 = vpop.f32.mrf.mxu0  ;;  %2337 = vst [vmem:[#allocation23 + $0x10] sm:$0xff] (%p4774_p0), %v4888_v28 }
 0x21b   :  { %2385 = dma.vmem_to_hbm [thread:$0]  (%p4774_p0), %s2381_s18, 384, %s2383_s9, [#allocation24]  }
 0x221   : > { %v2075_v29 = vpop.f32.mrf.mxu2 }
 0x222   : > { %v2103_v25 = vpop.f32.mrf.mxu0  ;;  %v2076_v30 = vadd.f32 %v2075_v29, %v2062_v56 }
 0x224   : > { %v2089_v33 = vadd.f32 %v2088_v9, %v2076_v30 }
 0x226   : > { %v2157_v16 = vadd.f32 %v2155_v31, %v2089_v33 }
 0x228   : > { %v4762_v17 = vsub.f32 %v2157_v16, %v3407_v36   ;;  %v4893_v16 = vmov %v4888_v28 }
 0x229   : > { %v2077_v11 = vpop.f32.mrf.mxu2 }
 0x22a   : > { %v4889_v34 = vmov %v4762_v17  ;;  %v4898_v11 = vmov %v4877_v23 }
 0x22b   : > { %v2114_v35 = vpop.f32.mrf.mxu1  ;;  %vm2161_vm9 = vcmp.gt.f32.partialorder %v4889_v34, 1.0  ;;  %2338 = vst [vmem:[#allocation25] sm:$0xff] (%p4774_p0), %v4889_v34 }
 0x22c   : > { %vm3475_vm10 = vmpackc.low %vm2161_vm9, %vm2161_vm9  ;;  %v2115_v41 = vadd.f32 %v2114_v35, %v2101_v59 }
 0x22d   : > { %3476 = vmatmul.msk.bf16.vlgmr.msra.gmra.mxu3 %vm3475_vm10, %v4354_v27 }
 0x233   : > { %v2116_v40 = vpop.f32.mrf.mxu1 }
 0x241   : > { %v2127_v44 = vpop.f32.mrf.mxu2 }
 0x242   : > { %v2128_v45 = vadd.f32 %v2127_v44, %v2115_v41 }
 0x244   : > { %v2158_v47 = vadd.f32 %v2156_v43, %v2128_v45 }
 0x246   : > { %v2160_v50 = vsub.f32 %v2158_v47, %v3408_v37  }
 0x248   : > { %vm2162_vm12 = vcmp.gt.f32.partialorder %v2160_v50, 1.0  ;;  %2339 = vst [vmem:[#allocation25 + $0x8] sm:$0xff] (%p4774_p0), %v2160_v50 }
 0x249   : > { %vm3477_vm13 = vmpackc.low %vm2162_vm12, %vm2162_vm12  ;;  %v2129_v17 = vpop.f32.mrf.mxu2  ;;  %2396 = dma.vmem_to_hbm [thread:$0]  (%p4774_p0), %s2392_s26, 256, %s2394_s2, [#allocation24]  }
 0x24a   : > { %3478 = vmatmul.msk.bf16.vlgmr.msrb.gmra.mxu0 %vm3477_vm13, %v4354_v27  ;;  %v4892_v17 = vmov %v4889_v34 }
 0x2b0   : > { %v2309_v9 = vpop.f32.mrf.mxu3 }
 0x2b1   : > { %v2310_v51 = vadd.f32 %v2309_v9, %v2202_v10  ;;  %v4899_v10 = vmov %v4868_v63  ;;  %v4900_v9 = vmov %v4867_v62 }
 0x2b8   : > { %v2311_v13 = vpop.f32.mrf.mxu3 }
 0x2b9   : > { %v4896_v13 = vmov %v4883_v39 }
 0x2c7   : > { %v2322_v53 = vpop.f32.mrf.mxu0 }
 0x2c8   : > { %v2323_v15 = vadd.f32 %v2322_v53, %v2310_v51 }
 0x2ca   : > { %2327 = vst [vmem:[%s2326_s3] sm:$0xff] %v2323_v15  ;;  %v4894_v15 = vmov %v4886_v42 }
 0x2cb   :  { %2352 = dma.vmem_to_hbm [thread:$0]  (%p4774_p0), %s2345_s15, 512, %s2347_s21, [#allocation4], %s4340_s20, %s4340_s20, %s4341_s22  }
 0x2cc   :  { %216 = sbr.rel (!%p4774_p0) target bundleno = 57 (0x39), region = 149 }
 0x2cf   : > { %v2324_v18 = vpop.f32.mrf.mxu0 }
 0x2d0   : > { %v4891_v18 = vmov %v2160_v50 }
 0x2d1   :  { %4273 = dma.done.wait [#allocation4], 512  }
 0x2d2   :  { %4274 = vsyncadd [#allocation4], 4294966784 }
 0x2d3   :  { %4275 = dma.done.wait [#allocation21], 896  }
 0x2d4   :  { %4276 = vsyncadd [#allocation21], 4294966400 }
 0x2d5   :  { %4277 = dma.done.wait [#allocation24], 640  }
 0x2d6   :  { %4278 = vsyncadd [#allocation24], 4294966656 }
 0x2d7   :  { %2417 = vsyncpa [#allocation3], 1 }
 0x2d8   :  { %2418 = vsyncpa [#allocation6], 1 }
 0x2d9   :  { %2419 = vsyncpa [#allocation9], 1 }
 0x2da   :  { %2420 = vsyncpa [#allocation12], 1 }
 0x2db   :  { %2421 = vsyncpa [#allocation15], 1 }
 0x2dc   :  { %2422 = vsyncpa [#allocation18], 1 }
 0x2dd   :  { %2423 = vsyncpa [#allocation4], 1 }
 0x2de   :  { %2424 = vsyncpa [#allocation21], 1 }
 0x2df   :  { %2425 = vsyncpa [#allocation24], 1 }

</bundles_post_ra>
